<compile_context>
chip_gen: v5e
topology: v5e:2x2
jax: 0.10.0
libtpu: 0.0.40
codegen_flags: <defaults>
</compile_context>

<pallas_src>
import numpy as np
import jax
import jax.numpy as jnp
from jax.experimental import pallas as pl
from jax.experimental.pallas import tpu as pltpu

# ---------------- feature extraction hyper-parameters ----------------
SR = 16000
WIN = 400            # 25 ms window
HOP = 160            # 10 ms hop -> downsample rate 160
N_FFT = 512
N_FREQ = N_FFT // 2 + 1   # 257
N_MELS = 80

K_PAD = 512          # padded contraction dim (frame samples; rows >= WIN of basis are zero)
NF_PAD = 384         # padded frequency bins (multiple of 128)
N_MELS_PAD = 128     # padded output lanes (lane-dense stores; sliced back to 80)
MAX_TILE_T = 256     # frame rows per grid step (MXU M dim)
EPS = 1e-6


def _round_up(x, m):
    return ((x + m - 1) // m) * m


def _choose_tile(n_rows):
    # Big tiles feed the MXU; keep grid length >= 2 when possible so the "parallel"
    # grid axis can be sharded across both TensorCores on v7x.
    if n_rows >= 2 * MAX_TILE_T:
        return MAX_TILE_T
    if n_rows >= 2 * 128:
        return 128
    return min(_round_up(max(n_rows, 16), 16), MAX_TILE_T)


# ---------------- deterministic "parameters" (fused basis, mel fb) ----------------
def _hann_window(win):
    n = np.arange(win, dtype=np.float64)
    return 0.5 - 0.5 * np.cos(2.0 * np.pi * n / win)


def _windowed_dft_basis():
    """(K_PAD, 2*NF_PAD) fused [cos | sin] real-DFT basis with the Hann window folded in.
    Rows >= WIN and columns >= N_FREQ (per half) are zero, so frames can be raw
    512-sample waveform slices and padded lanes contribute nothing."""
    w = _hann_window(WIN)                                      # (400,)
    n = np.arange(WIN, dtype=np.float64)[:, None]
    k = np.arange(N_FREQ, dtype=np.float64)[None, :]
    ang = 2.0 * np.pi * n * k / N_FFT
    cos_b = w[:, None] * np.cos(ang)
    sin_b = -(w[:, None] * np.sin(ang))
    basis = np.zeros((K_PAD, 2 * NF_PAD), dtype=np.float32)
    basis[:WIN, :N_FREQ] = cos_b
    basis[:WIN, NF_PAD:NF_PAD + N_FREQ] = sin_b
    return basis


def _mel_filterbank(n_freq=N_FREQ, n_mels=N_MELS, sr=SR, n_fft=N_FFT, fmin=0.0, fmax=None):
    if fmax is None:
        fmax = sr / 2.0

    def hz_to_mel(f):
        return 2595.0 * np.log10(1.0 + f / 700.0)

    def mel_to_hz(m):
        return 700.0 * (10.0 ** (m / 2595.0) - 1.0)

    mel_pts = np.linspace(hz_to_mel(fmin), hz_to_mel(fmax), n_mels + 2)
    hz_pts = mel_to_hz(mel_pts)
    bins = np.floor((n_fft + 1) * hz_pts / sr).astype(np.int64)
    fb = np.zeros((n_freq, n_mels), dtype=np.float32)
    for m in range(1, n_mels + 1):
        left, center, right = bins[m - 1], bins[m], bins[m + 1]
        for k in range(left, center):
            if center > left:
                fb[k, m - 1] = (k - left) / (center - left)
        for k in range(center, right):
            if right > center:
                fb[k, m - 1] = (right - k) / (right - center)
    return fb


def _stacked_mel():
    """(2*NF_PAD, N_MELS_PAD) mel filterbank, padded and stacked twice vertically so that
    power(=[re|im]^2) @ mel_stacked == re^2 @ mel + im^2 @ mel."""
    fb = _mel_filterbank()
    melp = np.zeros((NF_PAD, N_MELS_PAD), dtype=np.float32)
    melp[:N_FREQ, :N_MELS] = fb
    return np.concatenate([melp, melp], axis=0)


# ---------------- Pallas kernel: fused DFT -> power -> mel -> log ----------------
def fbank_kernel(frames_ref, basis_ref, mel_ref, out_ref):
    # frames_ref: (TILE_T, K_PAD) bf16, basis_ref: (K_PAD, 2*NF_PAD) bf16,
    # mel_ref: (2*NF_PAD, N_MELS_PAD) bf16, out_ref: (TILE_T, N_MELS_PAD) f32.
    spec = jnp.dot(frames_ref[...], basis_ref[...],
                   preferred_element_type=jnp.float32)            # [re | im], MXU, f32 acc
    power = (spec * spec).astype(jnp.bfloat16)                    # power spectrum (VPU)
    mel = jnp.dot(power, mel_ref[...],
                  preferred_element_type=jnp.float32)             # mel energies, MXU
    out_ref[...] = jnp.log(mel + EPS)                             # log-mel (EUP)


def _fbank_pallas(frames, basis, mel_fb, tile_t):
    n_rows = frames.shape[0]
    assert n_rows % tile_t == 0
    grid = (n_rows // tile_t,)
    return pl.pallas_call(
        fbank_kernel,
        out_shape=jax.ShapeDtypeStruct((n_rows, N_MELS_PAD), jnp.float32),
        grid_spec=pltpu.PrefetchScalarGridSpec(
            num_scalar_prefetch=0,
            grid=grid,
            in_specs=[
                pl.BlockSpec((tile_t, K_PAD), lambda i: (i, 0)),
                pl.BlockSpec((K_PAD, 2 * NF_PAD), lambda i: (0, 0)),
                pl.BlockSpec((2 * NF_PAD, N_MELS_PAD), lambda i: (0, 0)),
            ],
            out_specs=pl.BlockSpec((tile_t, N_MELS_PAD), lambda i: (i, 0)),
        ),
        compiler_params=pltpu.CompilerParams(
            dimension_semantics=("parallel",),
        ),
    )(frames, basis, mel_fb)


# ---------------- UpstreamExpert.forward equivalent ----------------
class UpstreamExpertPallas:
    """JAX/Pallas re-implementation of the baseline UpstreamExpert (log-mel fbank)."""

    def __init__(self):
        self.output_dim = N_MELS
        # bf16 constants for native MXU throughput (f32 accumulation in-kernel).
        self.basis = jnp.asarray(_windowed_dft_basis(), dtype=jnp.bfloat16)   # (512, 768)
        self.mel_fb = jnp.asarray(_stacked_mel(), dtype=jnp.bfloat16)         # (768, 128)

    def get_output_dim(self):
        return self.output_dim

    def get_downsample_rate(self):
        return HOP

    def forward(self, wavs):
        # wavs: list of unpadded 1-D float32 arrays (16 kHz samples)
        wav_lengths = [int(w.shape[0]) for w in wavs]
        max_len = max(wav_lengths)
        B = len(wavs)

        # frame count (center=False), derived from the padded length
        T = 1 + (max_len - WIN) // HOP
        # each frame reads K_PAD raw samples (basis rows >= WIN are zero), so pad far enough
        req = max(max_len, (T - 1) * HOP + K_PAD)

        # pad_sequence(batch_first=True) equivalent
        padded = jnp.stack(
            [jnp.pad(w.astype(jnp.float32), (0, req - l)) for w, l in zip(wavs, wav_lengths)],
            axis=0,
        )                                                                    # (B, req)

        # TODO(synk): framing stays an XLA gather (K_PAD/HOP = 3.2x HBM blow-up); in-kernel
        # framing via overlapping pl.ds reads from a VMEM waveform slab would remove it.
        idx = jnp.arange(T)[:, None] * HOP + jnp.arange(K_PAD)[None, :]      # (T, K_PAD)
        frames = padded[:, idx].reshape(B * T, K_PAD).astype(jnp.bfloat16)   # (B*T, K_PAD)

        # pad rows to a tile multiple for the grid
        n_rows = B * T
        tile_t = _choose_tile(n_rows)
        n_rows_pad = _round_up(n_rows, tile_t)
        if n_rows_pad != n_rows:
            frames = jnp.concatenate(
                [frames, jnp.zeros((n_rows_pad - n_rows, K_PAD), jnp.bfloat16)], axis=0
            )

        feats = _fbank_pallas(frames, self.basis, self.mel_fb, tile_t)
        feats = feats[:n_rows, :N_MELS].reshape(B, T, N_MELS)

        # per-wav feature lengths; ratio derived from the padded length (robust even if
        # the first waveform is not the longest — fixes the review concern)
        ratio = T / float(max_len)
        feat_lengths = [min(T, int(round(l * ratio))) for l in wav_lengths]
        return [feats[i, :fl] for i, fl in enumerate(feat_lengths)]

    __call__ = forward


if __name__ == "__main__":
    key = jax.random.PRNGKey(0)
    k0, k1 = jax.random.split(key)
    # two small 16 kHz waveforms of different (unpadded) lengths
    wav0 = jax.random.normal(k0, (2000,), dtype=jnp.float32)
    wav1 = jax.random.normal(k1, (1600,), dtype=jnp.float32)

    expert = UpstreamExpertPallas()
    feats = expert([wav0, wav1])
    feats = [jax.block_until_ready(f) for f in feats]

    # ---- numpy reference mirroring the kernel's bf16 input quantization (f32 accumulate) ----
    def q16(a):
        return np.asarray(jnp.asarray(a, dtype=jnp.float32).astype(jnp.bfloat16).astype(jnp.float32))

    basis_f32 = np.asarray(jnp.asarray(expert.basis, dtype=jnp.float32))
    mel_f32 = np.asarray(jnp.asarray(expert.mel_fb, dtype=jnp.float32))

    max_len = 2000
    T_full = 1 + (max_len - WIN) // HOP            # 11
    req = max(max_len, (T_full - 1) * HOP + K_PAD)

    def ref_fbank(wav):
        wav = np.asarray(wav, dtype=np.float32)
        wp = np.zeros(req, np.float32)
        wp[: wav.shape[0]] = wav
        idx = np.arange(T_full)[:, None] * HOP + np.arange(K_PAD)[None, :]
        fr = q16(wp[idx])                          # (T, K_PAD)
        spec = fr @ basis_f32                      # f32
        power = q16(spec * spec)
        mel = power @ mel_f32
        return np.log(mel[:, :N_MELS] + EPS)

    ref0 = ref_fbank(wav0)
    ref1 = ref_fbank(wav1)

    np.testing.assert_allclose(np.asarray(feats[0]), ref0, rtol=2e-2, atol=2e-2)
    np.testing.assert_allclose(np.asarray(feats[1]), ref1[: feats[1].shape[0]], rtol=2e-2, atol=2e-2)
    assert feats[0].shape == (T_full, N_MELS)
    assert feats[1].shape == (int(round(1600 * T_full / max_len)), N_MELS)
    assert all(np.isfinite(np.asarray(f)).all() for f in feats)

    print("KERNEL_OK")
</pallas_src>

<mosaic_0001>
module attributes {stable_mosaic.version = 11 : i64} {
  func.func @fbank_kernel(%arg0: i32, %arg1: memref<32x512xbf16, #tpu.memory_space<vmem>>, %arg2: memref<512x768xbf16, #tpu.memory_space<vmem>>, %arg3: memref<768x128xbf16, #tpu.memory_space<vmem>>, %arg4: memref<32x128xf32, #tpu.memory_space<vmem>>) attributes {dimension_semantics = [#tpu.dimension_semantics<parallel>], iteration_bounds = array<i64: 1>, scalar_prefetch = 0 : i64, scratch_operands = 0 : i64, tpu.core_type = #tpu.core_type<tc>, window_params = [{transform_indices = @transform_0, window_bounds = array<i64: 32, 512>}, {pipeline_mode = #tpu.pipeline_mode<synchronous>, transform_indices = @transform_1, window_bounds = array<i64: 512, 768>}, {pipeline_mode = #tpu.pipeline_mode<synchronous>, transform_indices = @transform_2, window_bounds = array<i64: 768, 128>}, {transform_indices = @transform_3, window_bounds = array<i64: 32, 128>}]} {
    %c0 = arith.constant 0 : index
    %c0_0 = arith.constant 0 : index
    %0 = vector.load %arg1[%c0, %c0_0] : memref<32x512xbf16, #tpu.memory_space<vmem>>, vector<32x512xbf16>
    %c0_1 = arith.constant 0 : index
    %c0_2 = arith.constant 0 : index
    %1 = vector.load %arg2[%c0_1, %c0_2] : memref<512x768xbf16, #tpu.memory_space<vmem>>, vector<512x768xbf16>
    %cst = arith.constant dense<0.000000e+00> : vector<32x768xf32>
    %2 = tpu.matmul %0, %1, %cst {dimension_numbers = #tpu.dot_dimension_numbers<[1], [0], [0], [1], [0, 0, 1, 1], [], []>} : vector<32x512xbf16>, vector<512x768xbf16>, vector<32x768xf32> -> vector<32x768xf32>
    %3 = arith.mulf %2, %2 : vector<32x768xf32>
    %4 = arith.truncf %3 : vector<32x768xf32> to vector<32x768xbf16>
    %c0_3 = arith.constant 0 : index
    %c0_4 = arith.constant 0 : index
    %5 = vector.load %arg3[%c0_3, %c0_4] : memref<768x128xbf16, #tpu.memory_space<vmem>>, vector<768x128xbf16>
    %cst_5 = arith.constant dense<0.000000e+00> : vector<32x128xf32>
    %6 = tpu.matmul %4, %5, %cst_5 {dimension_numbers = #tpu.dot_dimension_numbers<[1], [0], [0], [1], [0, 0, 1, 1], [], []>} : vector<32x768xbf16>, vector<768x128xbf16>, vector<32x128xf32> -> vector<32x128xf32>
    %cst_6 = arith.constant 9.99999997E-7 : f32
    %7 = vector.broadcast %cst_6 : f32 to vector<32x128xf32>
    %8 = arith.addf %6, %7 : vector<32x128xf32>
    %9 = math.log %8 : vector<32x128xf32>
    %c0_7 = arith.constant 0 : index
    %c0_8 = arith.constant 0 : index
    %10 = vector.load %arg4[%c0_7, %c0_8] : memref<32x128xf32, #tpu.memory_space<vmem>>, vector<32x128xf32>
    tpu.vector_store %arg4[%c0_7, %c0_8], %9 {strides = array<i32>} : memref<32x128xf32, #tpu.memory_space<vmem>>, vector<32x128xf32>,
    return
  }
  func.func @transform_0(%arg0: i32) -> (i32, i32) {
    %c0_i32 = arith.constant 0 : i32
    %c0_i32_0 = arith.constant 0 : i32
    return %arg0, %c0_i32 : i32, i32
  }
  func.func @transform_1(%arg0: i32) -> (i32, i32) {
    %c0_i32 = arith.constant 0 : i32
    %c0_i32_0 = arith.constant 0 : i32
    %c0_i32_1 = arith.constant 0 : i32
    return %c0_i32, %c0_i32_0 : i32, i32
  }
  func.func @transform_2(%arg0: i32) -> (i32, i32) {
    %c0_i32 = arith.constant 0 : i32
    %c0_i32_0 = arith.constant 0 : i32
    %c0_i32_1 = arith.constant 0 : i32
    return %c0_i32, %c0_i32_0 : i32, i32
  }
  func.func @transform_3(%arg0: i32) -> (i32, i32) {
    %c0_i32 = arith.constant 0 : i32
    %c0_i32_0 = arith.constant 0 : i32
    return %arg0, %c0_i32 : i32, i32
  }
}

</mosaic_0001>

<bundles_post_ra>
// kernel: tpu_custom_call.1
= control target key start
LH: loop header
LB: loop body
LE: loop exit
PB: predicated region body
PF: predicated region fallthrough
CT: control target
= control target key end

     0   :  { %8 = vsyncpa [#allocation3], 0  ;;  %s3818_s0 = inlined_call_operand.hbm [shape: bf16[32,512], index: 0, kind: input, shape index: {}]   ;;  %s3819_s1 = inlined_call_operand.hbm [shape: bf16[512,768], index: 1, kind: input, shape index: {}]   ;;  %s3820_s2 = inlined_call_operand.hbm [shape: bf16[768,128], index: 2, kind: input, shape index: {}]   ;;  %s3821_s3 = inlined_call_operand.hbm [shape: f32[32,128], index: 3, kind: output, shape index: {}]  }
   0x1   :  { %9 = vsyncpa [#allocation6], 0  ;;  %s28_s14 = sshll.u32 %s3819_s1, 4  ;;  %s29_s14 = int_to_ptr.hbm [resolvable:$true] %s28_s14 }
   0x2   :  { %10 = vsyncpa [#allocation4], 0  ;;  %s3662_s15 = smov [#allocation5]   ;;  %s15_s19 = sshll.u32 %s3818_s0, 4  ;;  %s16_s19 = int_to_ptr.hbm [resolvable:$true] %s15_s19 }
   0x3   :  { %s30_s16 = sshll.u32 %s3662_s15, 4  ;;  %s3663_s20 = smov 384   ;;  %s31_s16 = int_to_ptr.vmem [resolvable:$true] %s30_s16 }
   0x4   :  { %s3664_s21 = smov 24   ;;  %s3665_s22 = smov [#allocation2]  }
   0x5   :  { %36 = dma.hbm_to_vmem [thread:$0]  %s29_s14, 24576, %s31_s16, [#allocation6], %s3663_s20, %s3663_s20, %s3664_s21  }
   0x6   :  { %s17_s23 = sshll.u32 %s3665_s22, 4  ;;  %s3666_s24 = smov 256   ;;  %s18_s23 = int_to_ptr.vmem [resolvable:$true] %s17_s23 }
   0x7   :  { %s3667_s25 = smov 16   ;;  %s41_s27 = sshll.u32 %s3820_s2, 4  ;;  %s42_s27 = int_to_ptr.hbm [resolvable:$true] %s41_s27 }
   0x8   :  { %23 = dma.hbm_to_vmem [thread:$0]  %s16_s19, 1024, %s18_s23, [#allocation3], %s3666_s24, %s3666_s24, %s3667_s25  }
   0x9   :  { %s3668_s28 = smov [#allocation7]   ;;  %s3669_s30 = smov 64  }
   0xa   :  { %s43_s29 = sshll.u32 %s3668_s28, 4  ;;  %s3670_s0 = smov 4   ;;  %s44_s29 = int_to_ptr.vmem [resolvable:$true] %s43_s29 }
   0xb   :  { %49 = dma.hbm_to_vmem [thread:$0]  %s42_s27, 6144, %s44_s29, [#allocation6], %s3669_s30, %s3669_s30, %s3670_s0  }
   0xc   :  { %3656 = dma.done.wait [#allocation3], 1024  }
   0xd   :  { %3657 = vsyncadd [#allocation3], 4294966272 }
   0xe   :  { %3658 = dma.done.wait [#allocation6], 30720  }
   0xf   :  { %3659 = vsyncadd [#allocation6], 4294936576  ;;  %v2486_v0 = vld [vmem:[#allocation5 + $0x150] sm:$0xf]  ;;  %v3329_v1 = vld [vmem:[#allocation5 + $0x164] sm:$0xf0] }
  0x10   :  { %v2678_v2 = vld [vmem:[#allocation5 + $0x2d0] sm:$0xf]  ;;  %v2487_v3 = vor.u32 %v3329_v1, %v2486_v0  ;;  %v3377_v4 = vld [vmem:[#allocation5 + $0x2e4] sm:$0xf0]  ;;  %v2462_v11 = vld [vmem:[#allocation5 + $0x120] sm:$0xf] }
  0x11   :  { %v2870_v5 = vld [vmem:[#allocation5 + $0x450] sm:$0xf]  ;;  %v3425_v6 = vld [vmem:[#allocation5 + $0x464] sm:$0xf0]  ;;  %v2679_v7 = vor.u32 %v3377_v4, %v2678_v2  ;;  %v3323_v13 = vld [vmem:[#allocation5 + $0x134] sm:$0xf0] }
  0x12   :  { %v2871_v8 = vor.u32 %v3425_v6, %v2870_v5  ;;  %v3062_v9 = vld [vmem:[#allocation5 + $0x5d0] sm:$0xf]  ;;  %v3473_v10 = vld [vmem:[#allocation5 + $0x5e4] sm:$0xf0]  ;;  %1262 = vmatpush.bf16.msra.mxu0 %v2487_v3  ;;  %v2654_v14 = vld [vmem:[#allocation5 + $0x2a0] sm:$0xf]  ;;  %v2463_v16 = vor.u32 %v3323_v13, %v2462_v11 }
  0x13   :  { %v3063_v12 = vor.u32 %v3473_v10, %v3062_v9  ;;  %v3371_v15 = vld [vmem:[#allocation5 + $0x2b4] sm:$0xf0]  ;;  %1281 = vmatpush.bf16.msra.mxu1 %v2679_v7  ;;  %v2846_v18 = vld [vmem:[#allocation5 + $0x420] sm:$0xf]  ;;  %v2438_v23 = vld [vmem:[#allocation5 + $0xf0] sm:$0xf] }
  0x14   :  { %1300 = vmatpush.bf16.msra.mxu2 %v2871_v8  ;;  %v2655_v17 = vor.u32 %v3371_v15, %v2654_v14  ;;  %v3419_v19 = vld [vmem:[#allocation5 + $0x434] sm:$0xf0]  ;;  %v3038_v20 = vld [vmem:[#allocation5 + $0x5a0] sm:$0xf]  ;;  %v3317_v24 = vld [vmem:[#allocation5 + $0x104] sm:$0xf0] }
  0x15   :  { %1319 = vmatpush.bf16.msra.mxu3 %v3063_v12  ;;  %v2847_v21 = vor.u32 %v3419_v19, %v2846_v18  ;;  %v3467_v22 = vld [vmem:[#allocation5 + $0x5b4] sm:$0xf0]  ;;  %v2630_v26 = vld [vmem:[#allocation5 + $0x270] sm:$0xf]  ;;  %v3365_v27 = vld [vmem:[#allocation5 + $0x284] sm:$0xf0]  ;;  %v2439_v29 = vor.u32 %v3317_v24, %v2438_v23 }
  0x16   :  { %v3039_v25 = vor.u32 %v3467_v22, %v3038_v20  ;;  %v2822_v28 = vld [vmem:[#allocation5 + $0x3f0] sm:$0xf]  ;;  %1263 = vmatpush.bf16.msra.mxu0 %v2463_v16  ;;  %v3413_v30 = vld [vmem:[#allocation5 + $0x404] sm:$0xf0]  ;;  %v2631_v33 = vor.u32 %v3365_v27, %v2630_v26  ;;  %v2414_v35 = vld [vmem:[#allocation5 + $0xc0] sm:$0xf] }
  0x17   :  { %v3014_v31 = vld [vmem:[#allocation5 + $0x570] sm:$0xf]  ;;  %v3461_v32 = vld [vmem:[#allocation5 + $0x584] sm:$0xf0]  ;;  %1282 = vmatpush.bf16.msra.mxu1 %v2655_v17  ;;  %v2823_v34 = vor.u32 %v3413_v30, %v2822_v28  ;;  %v3311_v36 = vld [vmem:[#allocation5 + $0xd4] sm:$0xf0] }
  0x18   :  { %1301 = vmatpush.bf16.msra.mxu2 %v2847_v21  ;;  %v2606_v37 = vld [vmem:[#allocation5 + $0x240] sm:$0xf]  ;;  %v3015_v38 = vor.u32 %v3461_v32, %v3014_v31  ;;  %v3359_v39 = vld [vmem:[#allocation5 + $0x254] sm:$0xf0]  ;;  %v2415_v44 = vor.u32 %v3311_v36, %v2414_v35  ;;  %v2390_v47 = vld [vmem:[#allocation5 + $0x90] sm:$0xf] }
  0x19   :  { %1320 = vmatpush.bf16.msra.mxu3 %v3039_v25  ;;  %v2798_v40 = vld [vmem:[#allocation5 + $0x3c0] sm:$0xf]  ;;  %v3407_v41 = vld [vmem:[#allocation5 + $0x3d4] sm:$0xf0]  ;;  %v2607_v45 = vor.u32 %v3359_v39, %v2606_v37  ;;  %v3305_v48 = vld [vmem:[#allocation5 + $0xa4] sm:$0xf0] }
  0x1a   :  { %v2990_v42 = vld [vmem:[#allocation5 + $0x540] sm:$0xf]  ;;  %v3455_v43 = vld [vmem:[#allocation5 + $0x554] sm:$0xf0]  ;;  %1264 = vmatpush.bf16.msra.mxu0 %v2439_v29  ;;  %v2799_v46 = vor.u32 %v3407_v41, %v2798_v40  ;;  %v2582_v49 = vld [vmem:[#allocation5 + $0x210] sm:$0xf]  ;;  %v2391_v56 = vor.u32 %v3305_v48, %v2390_v47 }
  0x1b   :  { %1283 = vmatpush.bf16.msra.mxu1 %v2631_v33  ;;  %v2991_v50 = vor.u32 %v3455_v43, %v2990_v42  ;;  %v3353_v51 = vld [vmem:[#allocation5 + $0x224] sm:$0xf0]  ;;  %v2774_v52 = vld [vmem:[#allocation5 + $0x390] sm:$0xf]  ;;  %v2366_v59 = vld [vmem:[#allocation5 + $0x60] sm:$0xf] }
  0x1c   :  { %1302 = vmatpush.bf16.msra.mxu2 %v2823_v34  ;;  %v3401_v53 = vld [vmem:[#allocation5 + $0x3a4] sm:$0xf0]  ;;  %v2966_v54 = vld [vmem:[#allocation5 + $0x510] sm:$0xf]  ;;  %v2583_v57 = vor.u32 %v3353_v51, %v2582_v49  ;;  %v3299_v60 = vld [vmem:[#allocation5 + $0x74] sm:$0xf0] }
  0x1d   :  { %1321 = vmatpush.bf16.msra.mxu3 %v3015_v38  ;;  %v3449_v55 = vld [vmem:[#allocation5 + $0x524] sm:$0xf0]  ;;  %v2775_v58 = vor.u32 %v3401_v53, %v2774_v52  ;;  %v2558_v61 = vld [vmem:[#allocation5 + $0x1e0] sm:$0xf]  ;;  %v3347_v63 = vld [vmem:[#allocation5 + $0x1f4] sm:$0xf0]  ;;  %v2367_v4 = vor.u32 %v3299_v60, %v2366_v59 }
  0x1e   :  { %1265 = vmatpush.bf16.msra.mxu0 %v2415_v44  ;;  %v2967_v62 = vor.u32 %v3449_v55, %v2966_v54  ;;  %v2750_v0 = vld [vmem:[#allocation5 + $0x360] sm:$0xf]  ;;  %v3395_v1 = vld [vmem:[#allocation5 + $0x374] sm:$0xf0]  ;;  %v2559_v5 = vor.u32 %v3347_v63, %v2558_v61  ;;  %v2342_v7 = vld [vmem:[#allocation5 + $0x30] sm:$0xf] }
  0x1f   :  { %1284 = vmatpush.bf16.msra.mxu1 %v2607_v45  ;;  %v2942_v2 = vld [vmem:[#allocation5 + $0x4e0] sm:$0xf]  ;;  %v3443_v3 = vld [vmem:[#allocation5 + $0x4f4] sm:$0xf0]  ;;  %v2751_v6 = vor.u32 %v3395_v1, %v2750_v0  ;;  %v3293_v8 = vld [vmem:[#allocation5 + $0x44] sm:$0xf0] }
  0x20   :  { %1303 = vmatpush.bf16.msra.mxu2 %v2799_v46  ;;  %v2534_v9 = vld [vmem:[#allocation5 + $0x1b0] sm:$0xf]  ;;  %v2943_v10 = vor.u32 %v3443_v3, %v2942_v2  ;;  %v3341_v11 = vld [vmem:[#allocation5 + $0x1c4] sm:$0xf0]  ;;  %v2318_v16 = vld [vmem:[#allocation5] sm:$0xf]  ;;  %v2343_v17 = vor.u32 %v3293_v8, %v2342_v7 }
  0x21   :  { %1322 = vmatpush.bf16.msra.mxu3 %v2991_v50  ;;  %v2726_v12 = vld [vmem:[#allocation5 + $0x330] sm:$0xf]  ;;  %v3389_v13 = vld [vmem:[#allocation5 + $0x344] sm:$0xf0]  ;;  %v3287_v18 = vld [vmem:[#allocation5 + $0x14] sm:$0xf0]  ;;  %v2535_v21 = vor.u32 %v3341_v11, %v2534_v9 }
  0x22   :  { %1266 = vmatpush.bf16.msra.mxu0 %v2391_v56  ;;  %v2918_v14 = vld [vmem:[#allocation5 + $0x4b0] sm:$0xf]  ;;  %v3437_v15 = vld [vmem:[#allocation5 + $0x4c4] sm:$0xf0]  ;;  %v2510_v19 = vld [vmem:[#allocation5 + $0x180] sm:$0xf]  ;;  %v2727_v22 = vor.u32 %v3389_v13, %v2726_v12  ;;  %v2319_v34 = vor.u32 %v3287_v18, %v2318_v16 }
  0x23   :  { %1285 = vmatpush.bf16.msra.mxu1 %v2583_v57  ;;  %v3335_v20 = vld [vmem:[#allocation5 + $0x194] sm:$0xf0]  ;;  %v2702_v23 = vld [vmem:[#allocation5 + $0x300] sm:$0xf]  ;;  %v2919_v26 = vor.u32 %v3437_v15, %v2918_v14  ;;  %v3278_v29 = vld [vmem:[#allocation2 + $0xc] sm:$0xf0] }
  0x24   :  { %1304 = vmatpush.bf16.msra.mxu2 %v2775_v58  ;;  %v3383_v24 = vld [vmem:[#allocation5 + $0x314] sm:$0xf0]  ;;  %v2894_v25 = vld [vmem:[#allocation5 + $0x480] sm:$0xf]  ;;  %v3276_v30 = vld [vmem:[#allocation2 + $0x4] sm:$0xf]  ;;  %v2511_v38 = vor.u32 %v3335_v20, %v2510_v19 }
  0x25   :  { %1323 = vmatpush.bf16.msra.mxu3 %v2967_v62  ;;  %v3431_v27 = vld [vmem:[#allocation5 + $0x494] sm:$0xf0]  ;;  %v2286_v28 = vld [vmem:[#allocation2] sm:$0xf]  ;;  %v2288_v31 = vld [vmem:[#allocation2 + $0x10] sm:$0xf0]  ;;  %v2703_v39 = vor.u32 %v3383_v24, %v2702_v23 }
  0x26   :  { %1267 = vmatpush.bf16.msra.mxu0 %v2367_v4  ;;  %v3422_v32 = vld [vmem:[#allocation5 + $0x454] sm:$0xf]  ;;  %v2872_v33 = vld [vmem:[#allocation5 + $0x468] sm:$0xf0]  ;;  %v2294_v35 = vld [vmem:[#allocation2 + $0x8] sm:$0xf]  ;;  %v2895_v43 = vor.u32 %v3431_v27, %v2894_v25  ;;  %v3703_v48 = vor.u32 %v3278_v29, %v2286_v28  ;;  %v3705_v53 = vor.u32 %v3276_v30, %v2288_v31 }
  0x27   :  { %1286 = vmatpush.bf16.msra.mxu1 %v2559_v5  ;;  %v3374_v36 = vld [vmem:[#allocation5 + $0x2d4] sm:$0xf]  ;;  %v2680_v37 = vld [vmem:[#allocation5 + $0x2e8] sm:$0xf0]  ;;  %v3279_v40 = vld [vmem:[#allocation2 + $0x14] sm:$0xf0]  ;;  %v2875_v44 = vor.u32 %v3422_v32, %v2872_v33 }
  0x28   :  { %1305 = vmatpush.bf16.msra.mxu2 %v2751_v6  ;;  %v3277_v41 = vld [vmem:[#allocation2 + $0xc] sm:$0xf]  ;;  %v2296_v42 = vld [vmem:[#allocation2 + $0x18] sm:$0xf0]  ;;  %v3326_v45 = vld [vmem:[#allocation5 + $0x154] sm:$0xf]  ;;  %v2683_v49 = vor.u32 %v3374_v36, %v2680_v37  ;;  %v3707_v54 = vor.u32 %v3279_v40, %v2294_v35 }
  0x29   :  { %1324 = vmatpush.bf16.msra.mxu3 %v2943_v10  ;;  %v2488_v46 = vld [vmem:[#allocation5 + $0x168] sm:$0xf0]  ;;  %v3470_v47 = vld [vmem:[#allocation5 + $0x5d4] sm:$0xf]  ;;  %v3416_v51 = vld [vmem:[#allocation5 + $0x424] sm:$0xf]  ;;  %v3709_v57 = vor.u32 %v3277_v41, %v2296_v42 }
  0x2a   :  { %1268 = vmatpush.bf16.msra.mxu0 %v2343_v17  ;;  %v3064_v50 = vld [vmem:[#allocation5 + $0x5e8] sm:$0xf0]  ;;  %v2848_v52 = vld [vmem:[#allocation5 + $0x438] sm:$0xf0]  ;;  %v3368_v55 = vld [vmem:[#allocation5 + $0x2a4] sm:$0xf]  ;;  %v2491_v58 = vor.u32 %v3326_v45, %v2488_v46 }
  0x2b   :  { %1287 = vmatpush.bf16.msra.mxu1 %v2535_v21  ;;  %v2656_v56 = vld [vmem:[#allocation5 + $0x2b8] sm:$0xf0]  ;;  %v3067_v59 = vor.u32 %v3470_v47, %v3064_v50  ;;  %v2851_v60 = vor.u32 %v3416_v51, %v2848_v52  ;;  %v3320_v61 = vld [vmem:[#allocation5 + $0x124] sm:$0xf]  ;;  %v3410_v2 = vld [vmem:[#allocation5 + $0x3f4] sm:$0xf] }
  0x2c   :  { %1306 = vmatpush.bf16.msra.mxu2 %v2727_v22  ;;  %v2464_v62 = vld [vmem:[#allocation5 + $0x138] sm:$0xf0]  ;;  %v3464_v63 = vld [vmem:[#allocation5 + $0x5a4] sm:$0xf]  ;;  %v2659_v0 = vor.u32 %v3368_v55, %v2656_v56  ;;  %v2824_v3 = vld [vmem:[#allocation5 + $0x408] sm:$0xf0] }
  0x2d   :  { %1325 = vmatpush.bf16.msra.mxu3 %v2919_v26  ;;  %v3040_v1 = vld [vmem:[#allocation5 + $0x5b8] sm:$0xf0]  ;;  %v3362_v4 = vld [vmem:[#allocation5 + $0x274] sm:$0xf]  ;;  %v2632_v5 = vld [vmem:[#allocation5 + $0x288] sm:$0xf0]  ;;  %v2467_v6 = vor.u32 %v3320_v61, %v2464_v62  ;;  %v2827_v8 = vor.u32 %v3410_v2, %v2824_v3 }
  0x2e   :  { %1269 = vmatpush.bf16.msra.mxu0 %v2319_v34  ;;  %v3043_v7 = vor.u32 %v3464_v63, %v3040_v1  ;;  %v3314_v9 = vld [vmem:[#allocation5 + $0xf4] sm:$0xf]  ;;  %v2440_v10 = vld [vmem:[#allocation5 + $0x108] sm:$0xf0]  ;;  %v2635_v12 = vor.u32 %v3362_v4, %v2632_v5  ;;  %v3404_v14 = vld [vmem:[#allocation5 + $0x3c4] sm:$0xf] }
  0x2f   :  { %1288 = vmatpush.bf16.msra.mxu1 %v2511_v38  ;;  %v3458_v11 = vld [vmem:[#allocation5 + $0x574] sm:$0xf]  ;;  %v3016_v13 = vld [vmem:[#allocation5 + $0x588] sm:$0xf0]  ;;  %v2800_v15 = vld [vmem:[#allocation5 + $0x3d8] sm:$0xf0]  ;;  %v2443_v18 = vor.u32 %v3314_v9, %v2440_v10 }
  0x30   :  { %1307 = vmatpush.bf16.msra.mxu2 %v2703_v39  ;;  %v3356_v16 = vld [vmem:[#allocation5 + $0x244] sm:$0xf]  ;;  %v2608_v17 = vld [vmem:[#allocation5 + $0x258] sm:$0xf0]  ;;  %v3019_v22 = vor.u32 %v3458_v11, %v3016_v13  ;;  %v2803_v23 = vor.u32 %v3404_v14, %v2800_v15  ;;  %v2302_v25 = vld [vmem:[#allocation2 + $0x20] sm:$0xf] }
  0x31   :  { %1326 = vmatpush.bf16.msra.mxu3 %v2895_v43  ;;  %1270 = vmatmul.bf16.vlgmr.msra.gmra.mxu0 %v3703_v48  ;;  %v3308_v19 = vld [vmem:[#allocation5 + $0xc4] sm:$0xf]  ;;  %v2416_v20 = vld [vmem:[#allocation5 + $0xd8] sm:$0xf0]  ;;  %v3282_v26 = vld [vmem:[#allocation2 + $0x2c] sm:$0xf0]  ;;  %v2611_v27 = vor.u32 %v3356_v16, %v2608_v17 }
  0x32   :  { %1289 = vmatmul.bf16.vlgmr.msra.gmra.mxu1 %v3705_v53  ;;  %1338 = vmatpush.bf16.msrb.mxu0 %v2491_v58  ;;  %v3452_v21 = vld [vmem:[#allocation5 + $0x544] sm:$0xf]  ;;  %v2992_v24 = vld [vmem:[#allocation5 + $0x558] sm:$0xf0]  ;;  %v2304_v29 = vld [vmem:[#allocation2 + $0x30] sm:$0xf0]  ;;  %v2419_v35 = vor.u32 %v3308_v19, %v2416_v20 }
  0x33   :  { %1357 = vmatpush.bf16.msrb.mxu1 %v2683_v49  ;;  %1308 = vmatmul.bf16.vlgmr.msra.gmra.mxu2 %v3707_v54  ;;  %v3280_v28 = vld [vmem:[#allocation2 + $0x24] sm:$0xf]  ;;  %v3398_v30 = vld [vmem:[#allocation5 + $0x394] sm:$0xf]  ;;  %v2776_v31 = vld [vmem:[#allocation5 + $0x3a8] sm:$0xf0]  ;;  %v2995_v39 = vor.u32 %v3452_v21, %v2992_v24 }
  0x34   :  { %1376 = vmatpush.bf16.msrb.mxu2 %v2875_v44  ;;  %1327 = vmatmul.bf16.vlgmr.msra.gmra.mxu3 %v3709_v57  ;;  %v2310_v32 = vld [vmem:[#allocation2 + $0x28] sm:$0xf]  ;;  %v3350_v33 = vld [vmem:[#allocation5 + $0x214] sm:$0xf]  ;;  %v2584_v34 = vld [vmem:[#allocation5 + $0x228] sm:$0xf0]  ;;  %v2779_v40 = vor.u32 %v3398_v30, %v2776_v31  ;;  %v3715_v44 = vor.u32 %v3282_v26, %v2302_v25  ;;  %v3717_v50 = vor.u32 %v3280_v28, %v2304_v29 }
  0x35   :  { %1395 = vmatpush.bf16.msrb.mxu3 %v3067_v59  ;;  %v3283_v36 = vld [vmem:[#allocation2 + $0x34] sm:$0xf0]  ;;  %v3281_v37 = vld [vmem:[#allocation2 + $0x2c] sm:$0xf]  ;;  %v2312_v38 = vld [vmem:[#allocation2 + $0x38] sm:$0xf0]  ;;  %v2587_v45 = vor.u32 %v3350_v33, %v2584_v34 }
  0x36   :  { %1339 = vmatpush.bf16.msrb.mxu0 %v2467_v6  ;;  %v3302_v41 = vld [vmem:[#allocation5 + $0x94] sm:$0xf]  ;;  %v2392_v42 = vld [vmem:[#allocation5 + $0xa8] sm:$0xf0]  ;;  %v3392_v47 = vld [vmem:[#allocation5 + $0x364] sm:$0xf]  ;;  %v3719_v51 = vor.u32 %v3283_v36, %v2310_v32  ;;  %v3721_v56 = vor.u32 %v3281_v37, %v2312_v38 }
  0x37   :  { %1358 = vmatpush.bf16.msrb.mxu1 %v2659_v0  ;;  %v3446_v43 = vld [vmem:[#allocation5 + $0x514] sm:$0xf]  ;;  %v2968_v46 = vld [vmem:[#allocation5 + $0x528] sm:$0xf0]  ;;  %v2752_v49 = vld [vmem:[#allocation5 + $0x378] sm:$0xf0]  ;;  %v2395_v58 = vor.u32 %v3302_v41, %v2392_v42 }
  0x38   :  { %1377 = vmatpush.bf16.msrb.mxu2 %v2851_v60  ;;  %v3344_v52 = vld [vmem:[#allocation5 + $0x1e4] sm:$0xf]  ;;  %v2560_v55 = vld [vmem:[#allocation5 + $0x1f8] sm:$0xf0]  ;;  %v2971_v59 = vor.u32 %v3446_v43, %v2968_v46  ;;  %v2755_v60 = vor.u32 %v3392_v47, %v2752_v49  ;;  %v3386_v2 = vld [vmem:[#allocation5 + $0x334] sm:$0xf] }
  0x39   :  { %1396 = vmatpush.bf16.msrb.mxu3 %v3043_v7  ;;  %v3296_v61 = vld [vmem:[#allocation5 + $0x64] sm:$0xf]  ;;  %v2368_v62 = vld [vmem:[#allocation5 + $0x78] sm:$0xf0]  ;;  %v2563_v0 = vor.u32 %v3344_v52, %v2560_v55  ;;  %v2728_v3 = vld [vmem:[#allocation5 + $0x348] sm:$0xf0] }
  0x3a   :  { %1340 = vmatpush.bf16.msrb.mxu0 %v2443_v18  ;;  %v3440_v63 = vld [vmem:[#allocation5 + $0x4e4] sm:$0xf]  ;;  %v2944_v1 = vld [vmem:[#allocation5 + $0x4f8] sm:$0xf0]  ;;  %v3338_v4 = vld [vmem:[#allocation5 + $0x1b4] sm:$0xf]  ;;  %v2371_v6 = vor.u32 %v3296_v61, %v2368_v62  ;;  %v2731_v9 = vor.u32 %v3386_v2, %v2728_v3 }
  0x3b   :  { %1359 = vmatpush.bf16.msrb.mxu1 %v2635_v12  ;;  %v2536_v5 = vld [vmem:[#allocation5 + $0x1c8] sm:$0xf0]  ;;  %v3290_v7 = vld [vmem:[#allocation5 + $0x34] sm:$0xf]  ;;  %v3380_v14 = vld [vmem:[#allocation5 + $0x304] sm:$0xf] }
  0x3c   :  { %1378 = vmatpush.bf16.msrb.mxu2 %v2827_v8  ;;  %v2947_v8 = vor.u32 %v3440_v63, %v2944_v1  ;;  %v2344_v10 = vld [vmem:[#allocation5 + $0x48] sm:$0xf0]  ;;  %v3434_v11 = vld [vmem:[#allocation5 + $0x4b4] sm:$0xf]  ;;  %v2539_v13 = vor.u32 %v3338_v4, %v2536_v5  ;;  %v2704_v15 = vld [vmem:[#allocation5 + $0x318] sm:$0xf0] }
  0x3d   :  { %1397 = vmatpush.bf16.msrb.mxu3 %v3019_v22  ;;  %v2920_v12 = vld [vmem:[#allocation5 + $0x4c8] sm:$0xf0]  ;;  %v3332_v16 = vld [vmem:[#allocation5 + $0x184] sm:$0xf]  ;;  %v2512_v17 = vld [vmem:[#allocation5 + $0x198] sm:$0xf0]  ;;  %v2347_v20 = vor.u32 %v3290_v7, %v2344_v10  ;;  %v2707_v25 = vor.u32 %v3380_v14, %v2704_v15 }
  0x3e   :  { %1341 = vmatpush.bf16.msrb.mxu0 %v2419_v35  ;;  %v2878_v18 = vld [vmem:[#allocation5 + $0x458] sm:$0xf]  ;;  %v3426_v19 = vld [vmem:[#allocation5 + $0x46c] sm:$0xf0]  ;;  %v3284_v21 = vld [vmem:[#allocation5 + $0x4] sm:$0xf]  ;;  %v2923_v24 = vor.u32 %v3434_v11, %v2920_v12  ;;  %v2515_v29 = vor.u32 %v3332_v16, %v2512_v17 }
  0x3f   :  { %1360 = vmatpush.bf16.msrb.mxu1 %v2611_v27  ;;  %v2686_v22 = vld [vmem:[#allocation5 + $0x2d8] sm:$0xf]  ;;  %v2320_v26 = vld [vmem:[#allocation5 + $0x18] sm:$0xf0]  ;;  %v3428_v27 = vld [vmem:[#allocation5 + $0x484] sm:$0xf]  ;;  %v2879_v30 = vor.u32 %v3426_v19, %v2878_v18 }
  0x40   :  { %1379 = vmatpush.bf16.msrb.mxu2 %v2803_v23  ;;  %v3378_v23 = vld [vmem:[#allocation5 + $0x2ec] sm:$0xf0]  ;;  %v2896_v28 = vld [vmem:[#allocation5 + $0x498] sm:$0xf0]  ;;  %v2494_v31 = vld [vmem:[#allocation5 + $0x158] sm:$0xf]  ;;  %v2323_v38 = vor.u32 %v3284_v21, %v2320_v26 }
  0x41   :  { %1398 = vmatpush.bf16.msrb.mxu3 %v2995_v39  ;;  %1275 = vmatmul.bf16.gmra.mxu0 %v3715_v44  ;;  %v3330_v32 = vld [vmem:[#allocation5 + $0x16c] sm:$0xf0]  ;;  %v3070_v33 = vld [vmem:[#allocation5 + $0x5d8] sm:$0xf]  ;;  %v2687_v34 = vor.u32 %v3378_v23, %v2686_v22  ;;  %v2854_v36 = vld [vmem:[#allocation5 + $0x428] sm:$0xf]  ;;  %v2899_v39 = vor.u32 %v3428_v27, %v2896_v28 }
  0x42   :  { %1294 = vmatmul.bf16.gmra.mxu1 %v3717_v50  ;;  %1342 = vmatpush.bf16.msrb.mxu0 %v2395_v58  ;;  %v3474_v35 = vld [vmem:[#allocation5 + $0x5ec] sm:$0xf0]  ;;  %v3420_v37 = vld [vmem:[#allocation5 + $0x43c] sm:$0xf0]  ;;  %v2470_v41 = vld [vmem:[#allocation5 + $0x128] sm:$0xf] }
  0x43   :  { %1361 = vmatpush.bf16.msrb.mxu1 %v2587_v45  ;;  %1313 = vmatmul.bf16.gmra.mxu2 %v3719_v51  ;;  %v3324_v42 = vld [vmem:[#allocation5 + $0x13c] sm:$0xf0]  ;;  %v3071_v43 = vor.u32 %v3474_v35, %v3070_v33  ;;  %v2855_v45 = vor.u32 %v3420_v37, %v2854_v36  ;;  %v2662_v46 = vld [vmem:[#allocation5 + $0x2a8] sm:$0xf]  ;;  %v2830_v55 = vld [vmem:[#allocation5 + $0x3f8] sm:$0xf] }
  0x44   :  { %1380 = vmatpush.bf16.msrb.mxu2 %v2779_v40  ;;  %1332 = vmatmul.bf16.gmra.mxu3 %v3721_v56  ;;  %v2495_v40 = vor.u32 %v3330_v32, %v2494_v31  ;;  %v3372_v47 = vld [vmem:[#allocation5 + $0x2bc] sm:$0xf0]  ;;  %v3046_v49 = vld [vmem:[#allocation5 + $0x5a8] sm:$0xf]  ;;  %v3414_v58 = vld [vmem:[#allocation5 + $0x40c] sm:$0xf0] }
  0x45   :  { %1399 = vmatpush.bf16.msrb.mxu3 %v2971_v59  ;;  %v3468_v52 = vld [vmem:[#allocation5 + $0x5bc] sm:$0xf0]  ;;  %v2471_v59 = vor.u32 %v3324_v42, %v2470_v41  ;;  %v2446_v61 = vld [vmem:[#allocation5 + $0xf8] sm:$0xf]  ;;  %v3318_v62 = vld [vmem:[#allocation5 + $0x10c] sm:$0xf0] }
  0x46   :  { %1343 = vmatpush.bf16.msrb.mxu0 %v2371_v6  ;;  %v3047_v63 = vor.u32 %v3468_v52, %v3046_v49  ;;  %v2638_v1 = vld [vmem:[#allocation5 + $0x278] sm:$0xf]  ;;  %v3366_v2 = vld [vmem:[#allocation5 + $0x28c] sm:$0xf0]  ;;  %v2806_v5 = vld [vmem:[#allocation5 + $0x3c8] sm:$0xf]  ;;  %v2447_v7 = vor.u32 %v3318_v62, %v2446_v61 }
  0x47   :  { %1362 = vmatpush.bf16.msrb.mxu1 %v2563_v0  ;;  %v2831_v0 = vor.u32 %v3414_v58, %v2830_v55  ;;  %v3022_v3 = vld [vmem:[#allocation5 + $0x578] sm:$0xf]  ;;  %v3462_v4 = vld [vmem:[#allocation5 + $0x58c] sm:$0xf0]  ;;  %v3408_v6 = vld [vmem:[#allocation5 + $0x3dc] sm:$0xf0] }
  0x48   :  { %1381 = vmatpush.bf16.msrb.mxu2 %v2755_v60  ;;  %v2663_v60 = vor.u32 %v3372_v47, %v2662_v46  ;;  %v3312_v10 = vld [vmem:[#allocation5 + $0xdc] sm:$0xf0]  ;;  %v3023_v11 = vor.u32 %v3462_v4, %v3022_v3  ;;  %v2807_v12 = vor.u32 %v3408_v6, %v2806_v5  ;;  %v2998_v15 = vld [vmem:[#allocation5 + $0x548] sm:$0xf]  ;;  %v2782_v17 = vld [vmem:[#allocation5 + $0x398] sm:$0xf] }
  0x49   :  { %1400 = vmatpush.bf16.msrb.mxu3 %v2947_v8  ;;  %v2639_v8 = vor.u32 %v3366_v2, %v2638_v1  ;;  %v3360_v14 = vld [vmem:[#allocation5 + $0x25c] sm:$0xf0]  ;;  %v3402_v18 = vld [vmem:[#allocation5 + $0x3ac] sm:$0xf0]  ;;  %v2398_v21 = vld [vmem:[#allocation5 + $0x98] sm:$0xf] }
  0x4a   :  { %1344 = vmatpush.bf16.msrb.mxu0 %v2347_v20  ;;  %v3456_v16 = vld [vmem:[#allocation5 + $0x55c] sm:$0xf0]  ;;  %v3306_v22 = vld [vmem:[#allocation5 + $0xac] sm:$0xf0]  ;;  %v2974_v27 = vld [vmem:[#allocation5 + $0x518] sm:$0xf] }
  0x4b   :  { %1363 = vmatpush.bf16.msrb.mxu1 %v2539_v13  ;;  %v2614_v13 = vld [vmem:[#allocation5 + $0x248] sm:$0xf]  ;;  %v2999_v23 = vor.u32 %v3456_v16, %v2998_v15  ;;  %v3354_v26 = vld [vmem:[#allocation5 + $0x22c] sm:$0xf0]  ;;  %v2399_v31 = vor.u32 %v3306_v22, %v2398_v21  ;;  %v2734_v41 = vld [vmem:[#allocation5 + $0x338] sm:$0xf] }
  0x4c   :  { %1382 = vmatpush.bf16.msrb.mxu2 %v2731_v9  ;;  %v2422_v9 = vld [vmem:[#allocation5 + $0xc8] sm:$0xf]  ;;  %v2615_v20 = vor.u32 %v3360_v14, %v2614_v13  ;;  %v3450_v28 = vld [vmem:[#allocation5 + $0x52c] sm:$0xf0]  ;;  %v2350_v46 = vld [vmem:[#allocation5 + $0x38] sm:$0xf] }
  0x4d   :  { %1401 = vmatpush.bf16.msrb.mxu3 %v2923_v24  ;;  %v2423_v19 = vor.u32 %v3312_v10, %v2422_v9  ;;  %v2783_v24 = vor.u32 %v3402_v18, %v2782_v17  ;;  %v2374_v33 = vld [vmem:[#allocation5 + $0x68] sm:$0xf]  ;;  %v2975_v35 = vor.u32 %v3450_v28, %v2974_v27  ;;  %v3390_v42 = vld [vmem:[#allocation5 + $0x34c] sm:$0xf0]  ;;  %v2542_v55 = vld [vmem:[#allocation5 + $0x1b8] sm:$0xf] }
  0x4e   :  { %1345 = vmatpush.bf16.msrb.mxu0 %v2323_v38  ;;  %v2566_v37 = vld [vmem:[#allocation5 + $0x1e8] sm:$0xf]  ;;  %v3348_v38 = vld [vmem:[#allocation5 + $0x1fc] sm:$0xf0]  ;;  %v3294_v47 = vld [vmem:[#allocation5 + $0x4c] sm:$0xf0]  ;;  %v2735_v52 = vor.u32 %v3390_v42, %v2734_v41 }
  0x4f   :  { %1364 = vmatpush.bf16.msrb.mxu1 %v2515_v29  ;;  %v2758_v29 = vld [vmem:[#allocation5 + $0x368] sm:$0xf]  ;;  %v3342_v58 = vld [vmem:[#allocation5 + $0x1cc] sm:$0xf0]  ;;  %v3384_v62 = vld [vmem:[#allocation5 + $0x31c] sm:$0xf0]  ;;  %v2351_v1 = vor.u32 %v3294_v47, %v2350_v46 }
  0x50   :  { %1383 = vmatpush.bf16.msrb.mxu2 %v2707_v25  ;;  %v2590_v25 = vld [vmem:[#allocation5 + $0x218] sm:$0xf]  ;;  %v2710_v61 = vld [vmem:[#allocation5 + $0x308] sm:$0xf]  ;;  %v2543_v2 = vor.u32 %v3342_v58, %v2542_v55  ;;  %v3288_v4 = vld [vmem:[#allocation5 + $0x1c] sm:$0xf0] }
  0x51   :  { %1402 = vmatpush.bf16.msrb.mxu3 %v2899_v39  ;;  %1346 = vmatmul.bf16.vlgmr.msrb.gmra.mxu0 %v3703_v48  ;;  %v2591_v32 = vor.u32 %v3354_v26, %v2590_v25  ;;  %v2950_v39 = vld [vmem:[#allocation5 + $0x4e8] sm:$0xf]  ;;  %v3432_v10 = vld [vmem:[#allocation5 + $0x49c] sm:$0xf0]  ;;  %v2496_v13 = vld [vmem:[#allocation5 + $0x170] sm:$0xf0] }
  0x52   :  { %1414 = vmatpush.bf16.msra.mxu0 %v2495_v40  ;;  %1365 = vmatmul.bf16.vlgmr.msrb.gmra.mxu1 %v3705_v53  ;;  %v3444_v40 = vld [vmem:[#allocation5 + $0x4fc] sm:$0xf0]  ;;  %v2326_v3 = vld [vmem:[#allocation5 + $0x8] sm:$0xf]  ;;  %v3375_v14 = vld [vmem:[#allocation5 + $0x2dc] sm:$0xf] }
  0x53   :  { %1433 = vmatpush.bf16.msra.mxu1 %v2687_v34  ;;  %1384 = vmatmul.bf16.vlgmr.msrb.gmra.mxu2 %v3707_v54  ;;  %v3300_v34 = vld [vmem:[#allocation5 + $0x7c] sm:$0xf0]  ;;  %v2951_v49 = vor.u32 %v3444_v40, %v2950_v39  ;;  %v2518_v5 = vld [vmem:[#allocation5 + $0x188] sm:$0xf]  ;;  %v2688_v15 = vld [vmem:[#allocation5 + $0x2f0] sm:$0xf0]  ;;  %v2327_v18 = vor.u32 %v3288_v4, %v2326_v3 }
  0x54   :  { %1452 = vmatpush.bf16.msra.mxu2 %v2879_v30  ;;  %1403 = vmatmul.bf16.vlgmr.msrb.gmra.mxu3 %v3709_v57  ;;  %v3396_v30 = vld [vmem:[#allocation5 + $0x37c] sm:$0xf0]  ;;  %v2902_v9 = vld [vmem:[#allocation5 + $0x488] sm:$0xf]  ;;  %v3471_v16 = vld [vmem:[#allocation5 + $0x5dc] sm:$0xf] }
  0x55   :  { %1471 = vmatpush.bf16.msra.mxu3 %v3071_v43  ;;  %v2759_v36 = vor.u32 %v3396_v30, %v2758_v29  ;;  %v2375_v43 = vor.u32 %v3300_v34, %v2374_v33  ;;  %v3072_v17 = vld [vmem:[#allocation5 + $0x5f0] sm:$0xf0]  ;;  %v2856_v21 = vld [vmem:[#allocation5 + $0x440] sm:$0xf0]  ;;  %v2903_v22 = vor.u32 %v3432_v10, %v2902_v9  ;;  %v3321_v26 = vld [vmem:[#allocation5 + $0x12c] sm:$0xf] }
  0x56   :  { %1415 = vmatpush.bf16.msra.mxu0 %v2471_v59  ;;  %v2926_v59 = vld [vmem:[#allocation5 + $0x4b8] sm:$0xf]  ;;  %v3075_v25 = vor.u32 %v3471_v16, %v3072_v17  ;;  %v2472_v27 = vld [vmem:[#allocation5 + $0x140] sm:$0xf0]  ;;  %v3369_v29 = vld [vmem:[#allocation5 + $0x2ac] sm:$0xf] }
  0x57   :  { %1434 = vmatpush.bf16.msra.mxu1 %v2663_v60  ;;  %v3438_v60 = vld [vmem:[#allocation5 + $0x4cc] sm:$0xf0]  ;;  %v2664_v30 = vld [vmem:[#allocation5 + $0x2c0] sm:$0xf0]  ;;  %v3411_v34 = vld [vmem:[#allocation5 + $0x3fc] sm:$0xf] }
  0x58   :  { %1453 = vmatpush.bf16.msra.mxu2 %v2855_v45  ;;  %v2567_v45 = vor.u32 %v3348_v38, %v2566_v37  ;;  %v2927_v6 = vor.u32 %v3438_v60, %v2926_v59  ;;  %v3048_v33 = vld [vmem:[#allocation5 + $0x5c0] sm:$0xf0]  ;;  %v2448_v37 = vld [vmem:[#allocation5 + $0x110] sm:$0xf0]  ;;  %v2667_v38 = vor.u32 %v3369_v29, %v2664_v30  ;;  %v3363_v40 = vld [vmem:[#allocation5 + $0x27c] sm:$0xf] }
  0x59   :  { %1472 = vmatpush.bf16.msra.mxu3 %v3047_v63  ;;  %v3423_v63 = vld [vmem:[#allocation5 + $0x45c] sm:$0xf]  ;;  %v2640_v41 = vld [vmem:[#allocation5 + $0x290] sm:$0xf0]  ;;  %v3405_v47 = vld [vmem:[#allocation5 + $0x3cc] sm:$0xf] }
  0x5a   :  { %1416 = vmatpush.bf16.msra.mxu0 %v2447_v7  ;;  %v2711_v7 = vor.u32 %v3384_v62, %v2710_v61  ;;  %v3024_v46 = vld [vmem:[#allocation5 + $0x590] sm:$0xf0]  ;;  %v2424_v55 = vld [vmem:[#allocation5 + $0xe0] sm:$0xf0]  ;;  %v2643_v58 = vor.u32 %v3363_v40, %v2640_v41  ;;  %v3357_v60 = vld [vmem:[#allocation5 + $0x24c] sm:$0xf] }
  0x5b   :  { %1435 = vmatpush.bf16.msra.mxu1 %v2639_v8  ;;  %v3336_v8 = vld [vmem:[#allocation5 + $0x19c] sm:$0xf0]  ;;  %v2616_v61 = vld [vmem:[#allocation5 + $0x260] sm:$0xf0]  ;;  %v2784_v3 = vld [vmem:[#allocation5 + $0x3b0] sm:$0xf0] }
  0x5c   :  { %1454 = vmatpush.bf16.msra.mxu2 %v2831_v0  ;;  %v2880_v0 = vld [vmem:[#allocation5 + $0x470] sm:$0xf0]  ;;  %v3303_v4 = vld [vmem:[#allocation5 + $0x9c] sm:$0xf]  ;;  %v3297_v16 = vld [vmem:[#allocation5 + $0x6c] sm:$0xf] }
  0x5d   :  { %1473 = vmatpush.bf16.msra.mxu3 %v3023_v11  ;;  %v2883_v11 = vor.u32 %v3423_v63, %v2880_v0  ;;  %v3453_v0 = vld [vmem:[#allocation5 + $0x54c] sm:$0xf]  ;;  %v2592_v9 = vld [vmem:[#allocation5 + $0x230] sm:$0xf0]  ;;  %v2376_v17 = vld [vmem:[#allocation5 + $0x80] sm:$0xf0] }
  0x5e   :  { %1417 = vmatpush.bf16.msra.mxu0 %v2423_v19  ;;  %v2519_v19 = vor.u32 %v3336_v8, %v2518_v5  ;;  %v2400_v5 = vld [vmem:[#allocation5 + $0xb0] sm:$0xf0]  ;;  %v3351_v8 = vld [vmem:[#allocation5 + $0x21c] sm:$0xf]  ;;  %v3285_v40 = vld [vmem:[#allocation5 + $0xc] sm:$0xf] }
  0x5f   :  { %1436 = vmatpush.bf16.msra.mxu1 %v2615_v20  ;;  %v3417_v20 = vld [vmem:[#allocation5 + $0x42c] sm:$0xf]  ;;  %v2352_v29 = vld [vmem:[#allocation5 + $0x50] sm:$0xf0]  ;;  %v2328_v41 = vld [vmem:[#allocation5 + $0x20] sm:$0xf0] }
  0x60   :  { %1455 = vmatpush.bf16.msra.mxu2 %v2807_v12  ;;  %v3327_v12 = vld [vmem:[#allocation5 + $0x15c] sm:$0xf]  ;;  %v2859_v28 = vor.u32 %v3417_v20, %v2856_v21  ;;  %v3345_v20 = vld [vmem:[#allocation5 + $0x1ec] sm:$0xf]  ;;  %v2568_v21 = vld [vmem:[#allocation5 + $0x200] sm:$0xf0] }
  0x61   :  { %1474 = vmatpush.bf16.msra.mxu3 %v2999_v23  ;;  %1351 = vmatmul.bf16.gmra.mxu0 %v3715_v44  ;;  %v2499_v23 = vor.u32 %v3327_v12, %v2496_v13  ;;  %v3447_v12 = vld [vmem:[#allocation5 + $0x51c] sm:$0xf]  ;;  %v2976_v13 = vld [vmem:[#allocation5 + $0x530] sm:$0xf0]  ;;  %v2571_v30 = vor.u32 %v3345_v20, %v2568_v21  ;;  %s3671_s2 = smov [#allocation8]   ;;  %s2270_s7 = sshll.u32 %s3821_s3, 4  ;;  %s2271_s7 = int_to_ptr.hbm [resolvable:$true] %s2270_s7 }
  0x62   :  { %1418 = vmatpush.bf16.msra.mxu0 %v2399_v31  ;;  %1370 = vmatmul.bf16.gmra.mxu1 %v3717_v50  ;;  %v2475_v31 = vor.u32 %v3321_v26, %v2472_v27  ;;  %v3387_v26 = vld [vmem:[#allocation5 + $0x33c] sm:$0xf]  ;;  %v2736_v27 = vld [vmem:[#allocation5 + $0x350] sm:$0xf0]  ;;  %s2268_s4 = sshll.u32 %s3671_s2, 4  ;;  %s3672_s8 = smov 128   ;;  %s2269_s4 = int_to_ptr.vmem [resolvable:$true] %s2268_s4 }
  0x63   :  { %1437 = vmatpush.bf16.msra.mxu1 %v2591_v32  ;;  %1389 = vmatmul.bf16.gmra.mxu2 %v3719_v51  ;;  %v3465_v32 = vld [vmem:[#allocation5 + $0x5ac] sm:$0xf]  ;;  %s3673_s9 = smov 8  }
  0x64   :  { %1456 = vmatpush.bf16.msra.mxu2 %v2783_v24  ;;  %1408 = vmatmul.bf16.gmra.mxu3 %v3721_v56  ;;  %v2691_v24 = vor.u32 %v3375_v14, %v2688_v15  ;;  %v3051_v39 = vor.u32 %v3465_v32, %v3048_v33  ;;  %v3393_v14 = vld [vmem:[#allocation5 + $0x36c] sm:$0xf]  ;;  %v2760_v15 = vld [vmem:[#allocation5 + $0x380] sm:$0xf0]  ;;  %v3339_v32 = vld [vmem:[#allocation5 + $0x1bc] sm:$0xf] }
  0x65   :  { %1475 = vmatpush.bf16.msra.mxu3 %v2975_v35  ;;  %v2832_v35 = vld [vmem:[#allocation5 + $0x410] sm:$0xf0] }
  0x66   :  { %1419 = vmatpush.bf16.msra.mxu0 %v2375_v43  ;;  %v2835_v42 = vor.u32 %v3411_v34, %v2832_v35  ;;  %v2544_v33 = vld [vmem:[#allocation5 + $0x1d0] sm:$0xf0]  ;;  %v3435_v34 = vld [vmem:[#allocation5 + $0x4bc] sm:$0xf]  ;;  %v2739_v35 = vor.u32 %v3387_v26, %v2736_v27  ;;  %v3030_v26 = vld [vmem:[#allocation5 + $0x580] sm:$0xf] }
  0x67   :  { %1438 = vmatpush.bf16.msra.mxu1 %v2567_v45  ;;  %v3459_v45 = vld [vmem:[#allocation5 + $0x57c] sm:$0xf]  ;;  %v3463_v27 = vld [vmem:[#allocation5 + $0x594] sm:$0xf0] }
  0x68   :  { %1457 = vmatpush.bf16.msra.mxu2 %v2759_v36  ;;  %v3315_v36 = vld [vmem:[#allocation5 + $0xfc] sm:$0xf]  ;;  %v3027_v59 = vor.u32 %v3459_v45, %v3024_v46  ;;  %v2502_v45 = vld [vmem:[#allocation5 + $0x160] sm:$0xf]  ;;  %v3331_v46 = vld [vmem:[#allocation5 + $0x174] sm:$0xf0] }
  0x69   :  { %1476 = vmatpush.bf16.msra.mxu3 %v2951_v49  ;;  %v2451_v43 = vor.u32 %v3315_v36, %v2448_v37  ;;  %v2808_v49 = vld [vmem:[#allocation5 + $0x3e0] sm:$0xf0]  ;;  %v2928_v37 = vld [vmem:[#allocation5 + $0x4d0] sm:$0xf0] }
  0x6a   :  { %1420 = vmatpush.bf16.msra.mxu0 %v2351_v1  ;;  %v2811_v62 = vor.u32 %v3405_v47, %v2808_v49  ;;  %v3000_v1 = vld [vmem:[#allocation5 + $0x560] sm:$0xf0]  ;;  %v2547_v47 = vor.u32 %v3339_v32, %v2544_v33  ;;  %v2931_v49 = vor.u32 %v3435_v34, %v2928_v37  ;;  %v3031_v33 = vor.u32 %v3463_v27, %v3030_v26  ;;  %v2430_v34 = vld [vmem:[#allocation5 + $0xd0] sm:$0xf]  ;;  %v3361_v37 = vld [vmem:[#allocation5 + $0x264] sm:$0xf0] }
  0x6b   :  { %1439 = vmatpush.bf16.msra.mxu1 %v2543_v2  ;;  %v3399_v2 = vld [vmem:[#allocation5 + $0x39c] sm:$0xf] }
  0x6c   :  { %1458 = vmatpush.bf16.msra.mxu2 %v2735_v52  ;;  %v3309_v52 = vld [vmem:[#allocation5 + $0xcc] sm:$0xf]  ;;  %v2787_v10 = vor.u32 %v3399_v2, %v2784_v3  ;;  %v3078_v2 = vld [vmem:[#allocation5 + $0x5e0] sm:$0xf]  ;;  %v3475_v3 = vld [vmem:[#allocation5 + $0x5f4] sm:$0xf0] }
  0x6d   :  { %1477 = vmatpush.bf16.msra.mxu3 %v2927_v6  ;;  %v2427_v63 = vor.u32 %v3309_v52, %v2424_v55  ;;  %v2619_v6 = vor.u32 %v3357_v60, %v2616_v61  ;;  %v3333_v52 = vld [vmem:[#allocation5 + $0x18c] sm:$0xf]  ;;  %v2520_v55 = vld [vmem:[#allocation5 + $0x1a0] sm:$0xf0]  ;;  %v2331_v60 = vor.u32 %v3285_v40, %v2328_v41 }
  0x6e   :  { %1421 = vmatpush.bf16.msra.mxu0 %v2327_v18  ;;  %v2595_v18 = vor.u32 %v3351_v8, %v2592_v9  ;;  %v2904_v61 = vld [vmem:[#allocation5 + $0x4a0] sm:$0xf0]  ;;  %v2523_v8 = vor.u32 %v3333_v52, %v2520_v55  ;;  %v2598_v52 = vld [vmem:[#allocation5 + $0x220] sm:$0xf]  ;;  %v3355_v55 = vld [vmem:[#allocation5 + $0x234] sm:$0xf0] }
  0x6f   :  { %1440 = vmatpush.bf16.msra.mxu1 %v2519_v19  ;;  %v2979_v19 = vor.u32 %v3447_v12, %v2976_v13  ;;  %v2670_v12 = vld [vmem:[#allocation5 + $0x2b0] sm:$0xf] }
  0x70   :  { %1459 = vmatpush.bf16.msra.mxu2 %v2711_v7  ;;  %v3003_v7 = vor.u32 %v3453_v0, %v3000_v1  ;;  %v2503_v1 = vor.u32 %v3331_v46, %v2502_v45 }
  0x71   :  { %1478 = vmatpush.bf16.msra.mxu3 %v2903_v22  ;;  %1422 = vmatmul.bf16.vlgmr.msra.gmra.mxu0 %v3703_v48  ;;  %v2763_v22 = vor.u32 %v3393_v14, %v2760_v15  ;;  %v3373_v15 = vld [vmem:[#allocation5 + $0x2c4] sm:$0xf0] }
  0x72   :  { %1490 = vmatpush.bf16.msrb.mxu0 %v2499_v23  ;;  %1441 = vmatmul.bf16.vlgmr.msra.gmra.mxu1 %v3705_v53  ;;  %v2379_v23 = vor.u32 %v3297_v16, %v2376_v17  ;;  %v3054_v16 = vld [vmem:[#allocation5 + $0x5b0] sm:$0xf]  ;;  %v3469_v17 = vld [vmem:[#allocation5 + $0x5c4] sm:$0xf0]  ;;  %v2671_v20 = vor.u32 %v3373_v15, %v2670_v12  ;;  %v3295_v15 = vld [vmem:[#allocation5 + $0x54] sm:$0xf0] }
  0x73   :  { %1509 = vmatpush.bf16.msrb.mxu1 %v2691_v24  ;;  %1460 = vmatmul.bf16.vlgmr.msra.gmra.mxu2 %v3707_v54  ;;  %v3441_v24 = vld [vmem:[#allocation5 + $0x4ec] sm:$0xf]  ;;  %v3055_v21 = vor.u32 %v3469_v17, %v3054_v16  ;;  %v2550_v16 = vld [vmem:[#allocation5 + $0x1c0] sm:$0xf]  ;;  %v3343_v17 = vld [vmem:[#allocation5 + $0x1d4] sm:$0xf0] }
  0x74   :  { %1528 = vmatpush.bf16.msrb.mxu2 %v2883_v11  ;;  %1479 = vmatmul.bf16.vlgmr.msra.gmra.mxu3 %v3709_v57  ;;  %v2403_v11 = vor.u32 %v3303_v4, %v2400_v5  ;;  %v2862_v4 = vld [vmem:[#allocation5 + $0x430] sm:$0xf]  ;;  %v3421_v5 = vld [vmem:[#allocation5 + $0x444] sm:$0xf0]  ;;  %v2551_v26 = vor.u32 %v3343_v17, %v2550_v16  ;;  %v3406_v16 = vld [vmem:[#allocation5 + $0x3d4] sm:$0xf] }
  0x75   :  { %1547 = vmatpush.bf16.msrb.mxu3 %v3075_v25  ;;  %v2952_v25 = vld [vmem:[#allocation5 + $0x500] sm:$0xf0]  ;;  %v2863_v13 = vor.u32 %v3421_v5, %v2862_v4  ;;  %v2574_v4 = vld [vmem:[#allocation5 + $0x1f0] sm:$0xf]  ;;  %v3349_v5 = vld [vmem:[#allocation5 + $0x204] sm:$0xf0] }
  0x76   :  { %1491 = vmatpush.bf16.msrb.mxu0 %v2475_v31  ;;  %v2955_v31 = vor.u32 %v3441_v24, %v2952_v25  ;;  %v2646_v24 = vld [vmem:[#allocation5 + $0x280] sm:$0xf]  ;;  %v3367_v25 = vld [vmem:[#allocation5 + $0x294] sm:$0xf0]  ;;  %v2575_v12 = vor.u32 %v3349_v5, %v2574_v4  ;;  %v3412_v4 = vld [vmem:[#allocation5 + $0x404] sm:$0xf] }
  0x77   :  { %1510 = vmatpush.bf16.msrb.mxu1 %v2667_v38  ;;  %v3381_v38 = vld [vmem:[#allocation5 + $0x30c] sm:$0xf]  ;;  %v2647_v32 = vor.u32 %v3367_v25, %v2646_v24  ;;  %v2334_v24 = vld [vmem:[#allocation5 + $0x10] sm:$0xf]  ;;  %v3289_v25 = vld [vmem:[#allocation5 + $0x24] sm:$0xf0] }
  0x78   :  { %1529 = vmatpush.bf16.msrb.mxu2 %v2859_v28  ;;  %v3291_v28 = vld [vmem:[#allocation5 + $0x3c] sm:$0xf]  ;;  %v2816_v17 = vld [vmem:[#allocation5 + $0x3e8] sm:$0xf0] }
  0x79   :  { %1548 = vmatpush.bf16.msrb.mxu3 %v3051_v39  ;;  %v2355_v36 = vor.u32 %v3291_v28, %v2352_v29  ;;  %v2712_v39 = vld [vmem:[#allocation5 + $0x320] sm:$0xf0]  ;;  %v2840_v5 = vld [vmem:[#allocation5 + $0x418] sm:$0xf0] }
  0x7a   :  { %1492 = vmatpush.bf16.msrb.mxu0 %v2451_v43  ;;  %v3427_v43 = vld [vmem:[#allocation5 + $0x474] sm:$0xf0] }
  0x7b   :  { %1511 = vmatpush.bf16.msrb.mxu1 %v2643_v58  ;;  %v3429_v58 = vld [vmem:[#allocation5 + $0x48c] sm:$0xf] }
  0x7c   :  { %1530 = vmatpush.bf16.msrb.mxu2 %v2835_v42  ;;  %v2886_v42 = vld [vmem:[#allocation5 + $0x460] sm:$0xf]  ;;  %v2907_v9 = vor.u32 %v3429_v58, %v2904_v61 }
  0x7d   :  { %1549 = vmatpush.bf16.msrb.mxu3 %v3027_v59  ;;  %v2715_v59 = vor.u32 %v3381_v38, %v2712_v39  ;;  %v2887_v0 = vor.u32 %v3427_v43, %v2886_v42  ;;  %v3006_v38 = vld [vmem:[#allocation5 + $0x550] sm:$0xf]  ;;  %v3457_v39 = vld [vmem:[#allocation5 + $0x564] sm:$0xf0]  ;;  %v2790_v42 = vld [vmem:[#allocation5 + $0x3a0] sm:$0xf] }
  0x7e   :  { %1493 = vmatpush.bf16.msrb.mxu0 %v2427_v63  ;;  %v3379_v63 = vld [vmem:[#allocation5 + $0x2f4] sm:$0xf0]  ;;  %v3007_v46 = vor.u32 %v3457_v39, %v3006_v38  ;;  %v2982_v58 = vld [vmem:[#allocation5 + $0x520] sm:$0xf]  ;;  %v2335_v38 = vor.u32 %v3289_v25, %v2334_v24  ;;  %v2696_v39 = vld [vmem:[#allocation5 + $0x2f8] sm:$0xf0] }
  0x7f   :  { %1512 = vmatpush.bf16.msrb.mxu1 %v2619_v6  ;;  %v2478_v6 = vld [vmem:[#allocation5 + $0x130] sm:$0xf]  ;;  %v3403_v43 = vld [vmem:[#allocation5 + $0x3b4] sm:$0xf0]  ;;  %v3454_v24 = vld [vmem:[#allocation5 + $0x554] sm:$0xf] }
  0x80   :  { %1531 = vmatpush.bf16.msrb.mxu2 %v2811_v62  ;;  %v2694_v62 = vld [vmem:[#allocation5 + $0x2e0] sm:$0xf]  ;;  %v3008_v25 = vld [vmem:[#allocation5 + $0x568] sm:$0xf0] }
  0x81   :  { %1550 = vmatpush.bf16.msrb.mxu3 %v3003_v7  ;;  %1427 = vmatmul.bf16.gmra.mxu0 %v3715_v44  ;;  %v3325_v7 = vld [vmem:[#allocation5 + $0x144] sm:$0xf0] }
  0x82   :  { %1494 = vmatpush.bf16.msrb.mxu0 %v2403_v11  ;;  %1446 = vmatmul.bf16.gmra.mxu1 %v3717_v50  ;;  %v3079_v11 = vor.u32 %v3475_v3, %v3078_v2  ;;  %v2479_v14 = vor.u32 %v3325_v7, %v2478_v6  ;;  %v2382_v2 = vld [vmem:[#allocation5 + $0x70] sm:$0xf]  ;;  %v3301_v3 = vld [vmem:[#allocation5 + $0x84] sm:$0xf0] }
  0x83   :  { %1513 = vmatpush.bf16.msrb.mxu1 %v2595_v18  ;;  %1465 = vmatmul.bf16.gmra.mxu2 %v3719_v51  ;;  %v2838_v18 = vld [vmem:[#allocation5 + $0x400] sm:$0xf]  ;;  %v2958_v6 = vld [vmem:[#allocation5 + $0x4f0] sm:$0xf]  ;;  %v3445_v7 = vld [vmem:[#allocation5 + $0x504] sm:$0xf0] }
  0x84   :  { %1532 = vmatpush.bf16.msrb.mxu2 %v2787_v10  ;;  %1484 = vmatmul.bf16.gmra.mxu3 %v3721_v56  ;;  %v2695_v10 = vor.u32 %v3379_v63, %v2694_v62  ;;  %v2766_v62 = vld [vmem:[#allocation5 + $0x370] sm:$0xf]  ;;  %v3397_v63 = vld [vmem:[#allocation5 + $0x384] sm:$0xf0] }
  0x85   :  { %1551 = vmatpush.bf16.msrb.mxu3 %v2979_v19  ;;  %v3415_v19 = vld [vmem:[#allocation5 + $0x414] sm:$0xf0] }
  0x86   :  { %1495 = vmatpush.bf16.msrb.mxu0 %v2379_v23  ;;  %v3319_v23 = vld [vmem:[#allocation5 + $0x114] sm:$0xf0]  ;;  %v2839_v28 = vor.u32 %v3415_v19, %v2838_v18  ;;  %v2934_v18 = vld [vmem:[#allocation5 + $0x4c0] sm:$0xf] }
  0x87   :  { %1514 = vmatpush.bf16.msrb.mxu1 %v2571_v30  ;;  %v2814_v30 = vld [vmem:[#allocation5 + $0x3d0] sm:$0xf]  ;;  %v3439_v19 = vld [vmem:[#allocation5 + $0x4d4] sm:$0xf0] }
  0x88   :  { %1533 = vmatpush.bf16.msrb.mxu2 %v2763_v22  ;;  %v2454_v22 = vld [vmem:[#allocation5 + $0x100] sm:$0xf]  ;;  %v2935_v27 = vor.u32 %v3439_v19, %v2934_v18 }
  0x89   :  { %1552 = vmatpush.bf16.msrb.mxu3 %v2955_v31  ;;  %v2455_v29 = vor.u32 %v3319_v23, %v2454_v22  ;;  %v3409_v31 = vld [vmem:[#allocation5 + $0x3e4] sm:$0xf0] }
  0x8a   :  { %1496 = vmatpush.bf16.msrb.mxu0 %v2355_v36  ;;  %v2622_v36 = vld [vmem:[#allocation5 + $0x250] sm:$0xf]  ;;  %v2815_v40 = vor.u32 %v3409_v31, %v2814_v30  ;;  %v3385_v23 = vld [vmem:[#allocation5 + $0x324] sm:$0xf0] }
  0x8b   :  { %1515 = vmatpush.bf16.msrb.mxu1 %v2547_v47  ;;  %v2623_v45 = vor.u32 %v3361_v37, %v2622_v36  ;;  %v2406_v47 = vld [vmem:[#allocation5 + $0xa0] sm:$0xf]  ;;  %v2910_v30 = vld [vmem:[#allocation5 + $0x490] sm:$0xf]  ;;  %v3433_v31 = vld [vmem:[#allocation5 + $0x4a4] sm:$0xf0] }
  0x8c   :  { %1534 = vmatpush.bf16.msrb.mxu2 %v2739_v35  ;;  %v3313_v35 = vld [vmem:[#allocation5 + $0xe4] sm:$0xf0]  ;;  %v3376_v36 = vld [vmem:[#allocation5 + $0x2e4] sm:$0xf] }
  0x8d   :  { %1553 = vmatpush.bf16.msrb.mxu3 %v2931_v49  ;;  %v2431_v41 = vor.u32 %v3313_v35, %v2430_v34  ;;  %v3307_v49 = vld [vmem:[#allocation5 + $0xb4] sm:$0xf0]  ;;  %v3328_v34 = vld [vmem:[#allocation5 + $0x164] sm:$0xf]  ;;  %v2504_v35 = vld [vmem:[#allocation5 + $0x178] sm:$0xf0] }
  0x8e   :  { %1497 = vmatpush.bf16.msrb.mxu0 %v2331_v60  ;;  %v2791_v60 = vor.u32 %v3403_v43, %v2790_v42  ;;  %v2407_v61 = vor.u32 %v3307_v49, %v2406_v47  ;;  %v2911_v43 = vor.u32 %v3433_v31, %v2910_v30  ;;  %v3418_v47 = vld [vmem:[#allocation5 + $0x434] sm:$0xf]  ;;  %v2864_v49 = vld [vmem:[#allocation5 + $0x448] sm:$0xf0] }
  0x8f   :  { %1516 = vmatpush.bf16.msrb.mxu1 %v2523_v8  ;;  %v2767_v8 = vor.u32 %v3397_v63, %v2766_v62  ;;  %v3466_v62 = vld [vmem:[#allocation5 + $0x5b4] sm:$0xf]  ;;  %v3056_v63 = vld [vmem:[#allocation5 + $0x5c8] sm:$0xf0] }
  0x90   :  { %1535 = vmatpush.bf16.msrb.mxu2 %v2715_v59  ;;  %v3451_v59 = vld [vmem:[#allocation5 + $0x534] sm:$0xf0] }
  0x91   :  { %1554 = vmatpush.bf16.msrb.mxu3 %v2907_v9  ;;  %1498 = vmatmul.bf16.vlgmr.msrb.gmra.mxu0 %v3703_v48  ;;  %v2383_v9 = vor.u32 %v3301_v3, %v2382_v2  ;;  %v3059_v3 = vor.u32 %v3466_v62, %v3056_v63 }
  0x92   :  { %1566 = vmatpush.bf16.msra.mxu0 %v2503_v1  ;;  %1517 = vmatmul.bf16.vlgmr.msrb.gmra.mxu1 %v3705_v53  ;;  %v2983_v1 = vor.u32 %v3451_v59, %v2982_v58  ;;  %v3322_v58 = vld [vmem:[#allocation5 + $0x134] sm:$0xf]  ;;  %v2480_v59 = vld [vmem:[#allocation5 + $0x148] sm:$0xf0] }
  0x93   :  { %1585 = vmatpush.bf16.msra.mxu1 %v2695_v10  ;;  %1536 = vmatmul.bf16.vlgmr.msrb.gmra.mxu2 %v3707_v54  ;;  %v2742_v10 = vld [vmem:[#allocation5 + $0x340] sm:$0xf] }
  0x94   :  { %1604 = vmatpush.bf16.msra.mxu2 %v2887_v0  ;;  %1555 = vmatmul.bf16.vlgmr.msrb.gmra.mxu3 %v3709_v57  ;;  %v2599_v0 = vor.u32 %v3355_v55, %v2598_v52  ;;  %v2699_v52 = vor.u32 %v3376_v36, %v2696_v39  ;;  %v3448_v39 = vld [vmem:[#allocation5 + $0x524] sm:$0xf] }
  0x95   :  { %1623 = vmatpush.bf16.msra.mxu3 %v3079_v11  ;;  %v3391_v11 = vld [vmem:[#allocation5 + $0x354] sm:$0xf0] }
  0x96   :  { %1567 = vmatpush.bf16.msra.mxu0 %v2479_v14  ;;  %v2358_v14 = vld [vmem:[#allocation5 + $0x40] sm:$0xf] }
  0x97   :  { %1586 = vmatpush.bf16.msra.mxu1 %v2671_v20  ;;  %v2718_v20 = vld [vmem:[#allocation5 + $0x310] sm:$0xf]  ;;  %v2359_v22 = vor.u32 %v3295_v15, %v2358_v14  ;;  %v2843_v14 = vor.u32 %v3412_v4, %v2840_v5  ;;  %v3292_v5 = vld [vmem:[#allocation5 + $0x44] sm:$0xf] }
  0x98   :  { %1605 = vmatpush.bf16.msra.mxu2 %v2863_v13  ;;  %v2959_v13 = vor.u32 %v3445_v7, %v2958_v6  ;;  %v2719_v37 = vor.u32 %v3385_v23, %v2718_v20  ;;  %v3316_v6 = vld [vmem:[#allocation5 + $0x104] sm:$0xf]  ;;  %v2456_v7 = vld [vmem:[#allocation5 + $0x118] sm:$0xf0]  ;;  %v3310_v20 = vld [vmem:[#allocation5 + $0xd4] sm:$0xf] }
  0x99   :  { %1624 = vmatpush.bf16.msra.mxu3 %v3055_v21  ;;  %v2743_v21 = vor.u32 %v3391_v11, %v2742_v10  ;;  %v2648_v10 = vld [vmem:[#allocation5 + $0x298] sm:$0xf0]  ;;  %v3460_v11 = vld [vmem:[#allocation5 + $0x584] sm:$0xf]  ;;  %v2459_v15 = vor.u32 %v3316_v6, %v2456_v7  ;;  %v2624_v23 = vld [vmem:[#allocation5 + $0x268] sm:$0xf0] }
  0x9a   :  { %1568 = vmatpush.bf16.msra.mxu0 %v2455_v29  ;;  %v3337_v29 = vld [vmem:[#allocation5 + $0x1a4] sm:$0xf0]  ;;  %v2360_v6 = vld [vmem:[#allocation5 + $0x58] sm:$0xf0]  ;;  %v3340_v7 = vld [vmem:[#allocation5 + $0x1c4] sm:$0xf] }
  0x9b   :  { %1587 = vmatpush.bf16.msra.mxu1 %v2647_v32  ;;  %v3424_v32 = vld [vmem:[#allocation5 + $0x464] sm:$0xf] }
  0x9c   :  { %1606 = vmatpush.bf16.msra.mxu2 %v2839_v28  ;;  %v2526_v28 = vld [vmem:[#allocation5 + $0x190] sm:$0xf] }
  0x9d   :  { %1625 = vmatpush.bf16.msra.mxu3 %v3031_v33  ;;  %v2888_v33 = vld [vmem:[#allocation5 + $0x478] sm:$0xf0]  ;;  %v2527_v42 = vor.u32 %v3337_v29, %v2526_v28  ;;  %v3400_v28 = vld [vmem:[#allocation5 + $0x3a4] sm:$0xf] }
  0x9e   :  { %1569 = vmatpush.bf16.msra.mxu0 %v2431_v41  ;;  %v3080_v41 = vld [vmem:[#allocation5 + $0x5f8] sm:$0xf0] }
  0x9f   :  { %1588 = vmatpush.bf16.msra.mxu1 %v2623_v45  ;;  %v2891_v45 = vor.u32 %v3424_v32, %v2888_v33  ;;  %v2792_v29 = vld [vmem:[#allocation5 + $0x3b8] sm:$0xf0]  ;;  %v3011_v32 = vor.u32 %v3454_v24, %v3008_v25  ;;  %v3304_v33 = vld [vmem:[#allocation5 + $0xa4] sm:$0xf]  ;;  %v3334_v24 = vld [vmem:[#allocation5 + $0x194] sm:$0xf] }
  0xa0   :  { %1607 = vmatpush.bf16.msra.mxu2 %v2815_v40  ;;  %v3472_v40 = vld [vmem:[#allocation5 + $0x5e4] sm:$0xf]  ;;  %v2528_v25 = vld [vmem:[#allocation5 + $0x1a8] sm:$0xf0] }
  0xa1   :  { %1626 = vmatpush.bf16.msra.mxu3 %v3007_v46  ;;  %1503 = vmatmul.bf16.gmra.mxu0 %v3715_v44  ;;  %v2507_v46 = vor.u32 %v3328_v34, %v2504_v35  ;;  %v3083_v55 = vor.u32 %v3472_v40, %v3080_v41  ;;  %v2408_v34 = vld [vmem:[#allocation5 + $0xb8] sm:$0xf0]  ;;  %v3352_v35 = vld [vmem:[#allocation5 + $0x224] sm:$0xf] }
  0xa2   :  { %1570 = vmatpush.bf16.msra.mxu0 %v2407_v61  ;;  %1522 = vmatmul.bf16.gmra.mxu1 %v3717_v50  ;;  %v2672_v61 = vld [vmem:[#allocation5 + $0x2c8] sm:$0xf0]  ;;  %v2984_v40 = vld [vmem:[#allocation5 + $0x538] sm:$0xf0] }
  0xa3   :  { %1589 = vmatpush.bf16.msra.mxu1 %v2599_v0  ;;  %1541 = vmatmul.bf16.gmra.mxu2 %v3719_v51  ;;  %v2867_v0 = vor.u32 %v3418_v47, %v2864_v49  ;;  %v2987_v49 = vor.u32 %v3448_v39, %v2984_v40  ;;  %v3491_v39 = vld [vmem:[#allocation7 + $0x78] sm:$0xff] }
  0xa4   :  { %1608 = vmatpush.bf16.msra.mxu2 %v2791_v60  ;;  %1560 = vmatmul.bf16.gmra.mxu3 %v3721_v56  ;;  %v3370_v60 = vld [vmem:[#allocation5 + $0x2b4] sm:$0xf] }
  0xa5   :  { %1627 = vmatpush.bf16.msra.mxu3 %v2983_v1  ;;  %v2483_v1 = vor.u32 %v3322_v58, %v2480_v59  ;;  %v2675_v2 = vor.u32 %v3370_v60, %v2672_v61  ;;  %v3346_v58 = vld [vmem:[#allocation5 + $0x1f4] sm:$0xf]  ;;  %v2576_v59 = vld [vmem:[#allocation5 + $0x208] sm:$0xf0] }
  0xa6   :  { %1571 = vmatpush.bf16.msra.mxu0 %v2383_v9  ;;  %v3442_v60 = vld [vmem:[#allocation5 + $0x4f4] sm:$0xf]  ;;  %v2960_v61 = vld [vmem:[#allocation5 + $0x508] sm:$0xf0] }
  0xa7   :  { %1590 = vmatpush.bf16.msra.mxu1 %v2575_v12  ;;  %v3032_v12 = vld [vmem:[#allocation5 + $0x598] sm:$0xf0]  ;;  %v2963_v4 = vor.u32 %v3442_v60, %v2960_v61  ;;  %v3497_v60 = vld [vmem:[#allocation7 + $0xa8] sm:$0xff]  ;;  %v3480_v61 = vld [vmem:[#allocation7 + $0x20] sm:$0xff] }
  0xa8   :  { %1609 = vmatpush.bf16.msra.mxu2 %v2767_v8  ;;  %v3364_v8 = vld [vmem:[#allocation5 + $0x284] sm:$0xf]  ;;  %v3035_v19 = vor.u32 %v3460_v11, %v3032_v12  ;;  %v2552_v11 = vld [vmem:[#allocation5 + $0x1d8] sm:$0xf0] }
  0xa9   :  { %1628 = vmatpush.bf16.msra.mxu3 %v2959_v13  ;;  %v2651_v18 = vor.u32 %v3364_v8, %v2648_v10  ;;  %v3436_v12 = vld [vmem:[#allocation5 + $0x4c4] sm:$0xf] }
  0xaa   :  { %1572 = vmatpush.bf16.msra.mxu0 %v2359_v22  ;;  %v3358_v22 = vld [vmem:[#allocation5 + $0x254] sm:$0xf] }
  0xab   :  { %1591 = vmatpush.bf16.msra.mxu1 %v2551_v26  ;;  %v2819_v26 = vor.u32 %v3406_v16, %v2816_v17  ;;  %v2627_v31 = vor.u32 %v3358_v22, %v2624_v23  ;;  %v2363_v17 = vor.u32 %v3292_v5, %v2360_v6  ;;  %v3286_v22 = vld [vmem:[#allocation5 + $0x14] sm:$0xf]  ;;  %v2336_v23 = vld [vmem:[#allocation5 + $0x28] sm:$0xf0]  ;;  %v3479_v5 = vld [vmem:[#allocation7 + $0x18] sm:$0xff] }
  0xac   :  { %1610 = vmatpush.bf16.msra.mxu2 %v2743_v21  ;;  %v2432_v21 = vld [vmem:[#allocation5 + $0xe8] sm:$0xf0]  ;;  %v3494_v6 = vld [vmem:[#allocation7 + $0x90] sm:$0xff] }
  0xad   :  { %1629 = vmatpush.bf16.msra.mxu3 %v2935_v27  ;;  %v2435_v27 = vor.u32 %v3310_v20, %v2432_v21  ;;  %v2555_v20 = vor.u32 %v3340_v7, %v2552_v11 }
  0xae   :  { %1573 = vmatpush.bf16.msra.mxu0 %v2335_v38  ;;  %v3751_v9 = vpop.f32.mrf.mxu0  ;;  %v2600_v38 = vld [vmem:[#allocation5 + $0x238] sm:$0xf0] }
  0xaf   :  { %1592 = vmatpush.bf16.msra.mxu1 %v2527_v42  ;;  %v3753_v13 = vpop.f32.mrf.mxu1  ;;  %v2795_v42 = vor.u32 %v3400_v28, %v2792_v29  ;;  %v2603_v47 = vor.u32 %v3352_v35, %v2600_v38  ;;  %v2339_v29 = vor.u32 %v3286_v22, %v2336_v23  ;;  %v3483_v38 = vld [vmem:[#allocation7 + $0x38] sm:$0xff] }
  0xb0   :  { %1611 = vmatpush.bf16.msra.mxu2 %v2719_v37 }
  0xb1   :  { %1630 = vmatpush.bf16.msra.mxu3 %v2911_v43  ;;  %1574 = vmatmul.bf16.vlgmr.msra.gmra.mxu0 %v3703_v48  ;;  %v2411_v43 = vor.u32 %v3304_v33, %v2408_v34 }
  0xb2   :  { %1642 = vmatpush.bf16.msrb.mxu0 %v2507_v46  ;;  %1593 = vmatmul.bf16.vlgmr.msra.gmra.mxu1 %v3705_v53  ;;  %v2768_v46 = vld [vmem:[#allocation5 + $0x388] sm:$0xf0] }
  0xb3   :  { %1661 = vmatpush.bf16.msrb.mxu1 %v2699_v52  ;;  %1612 = vmatmul.bf16.vlgmr.msra.gmra.mxu2 %v3707_v54  ;;  %v3298_v52 = vld [vmem:[#allocation5 + $0x74] sm:$0xf] }
  0xb4   :  { %1680 = vmatpush.bf16.msrb.mxu2 %v2891_v45  ;;  %1631 = vmatmul.bf16.vlgmr.msra.gmra.mxu3 %v3709_v57  ;;  %v3394_v45 = vld [vmem:[#allocation5 + $0x374] sm:$0xf] }
  0xb5   :  { %1699 = vmatpush.bf16.msrb.mxu3 %v3083_v55  ;;  %v2384_v55 = vld [vmem:[#allocation5 + $0x88] sm:$0xf0]  ;;  %v2771_v62 = vor.u32 %v3394_v45, %v2768_v46  ;;  %v3490_v45 = vld [vmem:[#allocation7 + $0x70] sm:$0xff] }
  0xb6   :  { %1643 = vmatpush.bf16.msrb.mxu0 %v2483_v1  ;;  %v3759_v30 = vpop.f32.mrf.mxu2  ;;  %v3763_v37 = vpop.f32.mrf.mxu0  ;;  %v2387_v63 = vor.u32 %v3298_v52, %v2384_v55  ;;  %v2744_v1 = vld [vmem:[#allocation5 + $0x358] sm:$0xf0]  ;;  %v3498_v46 = vld [vmem:[#allocation7 + $0xb0] sm:$0xff] }
  0xb7   :  { %1662 = vmatpush.bf16.msrb.mxu1 %v2675_v2  ;;  %v3761_v36 = vpop.f32.mrf.mxu3  ;;  %v3765_v41 = vpop.f32.mrf.mxu1 }
  0xb8   :  { %1681 = vmatpush.bf16.msrb.mxu2 %v2867_v0  ;;  %v3388_v0 = vld [vmem:[#allocation5 + $0x344] sm:$0xf] }
  0xb9   :  { %1700 = vmatpush.bf16.msrb.mxu3 %v3059_v3  ;;  %v2579_v3 = vor.u32 %v3346_v58, %v2576_v59  ;;  %v2747_v16 = vor.u32 %v3388_v0, %v2744_v1  ;;  %v3481_v58 = vld [vmem:[#allocation7 + $0x28] sm:$0xff] }
  0xba   :  { %1644 = vmatpush.bf16.msrb.mxu0 %v2459_v15  ;;  %v3489_v59 = vld [vmem:[#allocation7 + $0x68] sm:$0xff] }
  0xbb   :  { %1663 = vmatpush.bf16.msrb.mxu1 %v2651_v18  ;;  %v3382_v18 = vld [vmem:[#allocation5 + $0x314] sm:$0xf] }
  0xbc   :  { %1682 = vmatpush.bf16.msrb.mxu2 %v2843_v14  ;;  %v2936_v14 = vld [vmem:[#allocation5 + $0x4d8] sm:$0xf0] }
  0xbd   :  { %1701 = vmatpush.bf16.msrb.mxu3 %v3035_v19  ;;  %v2720_v19 = vld [vmem:[#allocation5 + $0x328] sm:$0xf0]  ;;  %v2939_v21 = vor.u32 %v3436_v12, %v2936_v14 }
  0xbe   :  { %1645 = vmatpush.bf16.msrb.mxu0 %v2435_v27  ;;  %v3767_v2 = vpop.f32.mrf.mxu2  ;;  %v3771_v10 = vpop.f32.mrf.mxu0  ;;  %v2912_v27 = vld [vmem:[#allocation5 + $0x4a8] sm:$0xf0]  ;;  %v2723_v28 = vor.u32 %v3382_v18, %v2720_v19  ;;  %v1291_v18 = vadd.f32 %v3753_v13, %v3751_v9  ;;  %v3476_v9 = vld [vmem:[#allocation7] sm:$0xff] }
  0xbf   :  { %1664 = vmatpush.bf16.msrb.mxu1 %v2627_v31  ;;  %v3769_v8 = vpop.f32.mrf.mxu3  ;;  %v3773_v15 = vpop.f32.mrf.mxu1  ;;  %v3493_v19 = vld [vmem:[#allocation7 + $0x88] sm:$0xff]  ;;  %v3484_v13 = vld [vmem:[#allocation7 + $0x40] sm:$0xff] }
  0xc0   :  { %1683 = vmatpush.bf16.msrb.mxu2 %v2819_v26  ;;  %v3430_v26 = vld [vmem:[#allocation5 + $0x494] sm:$0xf] }
  0xc1   :  { %1702 = vmatpush.bf16.msrb.mxu3 %v3011_v32  ;;  %1579 = vmatmul.bf16.gmra.mxu0 %v3715_v44  ;;  %v2531_v32 = vor.u32 %v3334_v24, %v2528_v25  ;;  %v2915_v33 = vor.u32 %v3430_v26, %v2912_v27  ;;  %v3492_v25 = vld [vmem:[#allocation7 + $0x80] sm:$0xff]  ;;  %v3507_v27 = vld [vmem:[#allocation7 + $0xf8] sm:$0xff] }
  0xc2   :  { %1646 = vmatpush.bf16.msrb.mxu0 %v2411_v43  ;;  %1598 = vmatmul.bf16.gmra.mxu1 %v3717_v50  ;;  %v3482_v43 = vld [vmem:[#allocation7 + $0x30] sm:$0xff] }
  0xc3   :  { %1665 = vmatpush.bf16.msrb.mxu1 %v2603_v47  ;;  %1617 = vmatmul.bf16.gmra.mxu2 %v3719_v51 }
  0xc4   :  { %1684 = vmatpush.bf16.msrb.mxu2 %v2795_v42  ;;  %1636 = vmatmul.bf16.gmra.mxu3 %v3721_v56  ;;  %v3499_v42 = vld [vmem:[#allocation7 + $0xb8] sm:$0xff] }
  0xc5   :  { %1703 = vmatpush.bf16.msrb.mxu3 %v2987_v49 }
  0xc6   :  { %1647 = vmatpush.bf16.msrb.mxu0 %v2387_v63  ;;  %v3779_v31 = vpop.f32.mrf.mxu2  ;;  %v3783_v35 = vpop.f32.mrf.mxu0  ;;  %v3496_v63 = vld [vmem:[#allocation7 + $0xa0] sm:$0xff] }
  0xc7   :  { %1666 = vmatpush.bf16.msrb.mxu1 %v2579_v3  ;;  %v3781_v34 = vpop.f32.mrf.mxu3  ;;  %v3785_v40 = vpop.f32.mrf.mxu1 }
  0xc8   :  { %1685 = vmatpush.bf16.msrb.mxu2 %v2771_v62  ;;  %v3488_v62 = vld [vmem:[#allocation7 + $0x60] sm:$0xff] }
  0xc9   :  { %1704 = vmatpush.bf16.msrb.mxu3 %v2963_v4 }
  0xca   :  { %1648 = vmatpush.bf16.msrb.mxu0 %v2363_v17  ;;  %v3485_v17 = vld [vmem:[#allocation7 + $0x48] sm:$0xff] }
  0xcb   :  { %1667 = vmatpush.bf16.msrb.mxu1 %v2555_v20  ;;  %v1293_v20 = vadd.f32 %v3765_v41, %v3763_v37  ;;  %v1310_v37 = vadd.f32 %v3759_v30, %v1291_v18 }
  0xcc   :  { %1686 = vmatpush.bf16.msrb.mxu2 %v2747_v16  ;;  %v3477_v16 = vld [vmem:[#allocation7 + $0x8] sm:$0xff] }
  0xcd   :  { %1705 = vmatpush.bf16.msrb.mxu3 %v2939_v21  ;;  %v1312_v23 = vadd.f32 %v3767_v2, %v1293_v20  ;;  %v1329_v2 = vadd.f32 %v3761_v36, %v1310_v37  ;;  %v1298_v36 = vadd.f32 %v3785_v40, %v3783_v35 }
  0xce   :  { %1649 = vmatpush.bf16.msrb.mxu0 %v2339_v29  ;;  %v3787_v47 = vpop.f32.mrf.mxu2  ;;  %v1347_v52 = vpop.f32.mrf.mxu0 }
  0xcf   :  { %1668 = vmatpush.bf16.msrb.mxu1 %v2531_v32  ;;  %v3789_v49 = vpop.f32.mrf.mxu3  ;;  %v1366_v55 = vpop.f32.mrf.mxu1  ;;  %v3506_v32 = vld [vmem:[#allocation7 + $0xf0] sm:$0xff]  ;;  %v1718_v30 = vmul.f32 %v1329_v2, %v1329_v2 }
  0xd0   :  { %1687 = vmatpush.bf16.msrb.mxu2 %v2723_v28  ;;  %v1367_v21 = vadd.f32 %v1366_v55, %v1347_v52 }
  0xd1   :  { %1706 = vmatpush.bf16.msrb.mxu3 %v2915_v33  ;;  %1650 = vmatmul.bf16.vlgmr.msrb.gmra.mxu0 %v3703_v48  ;;  %v3487_v48 = vld [vmem:[#allocation7 + $0x58] sm:$0xff] }
  0xd2   :  { %2138 = vmatpush.bf16.msra.mxu0 %v3483_v38  ;;  %1669 = vmatmul.bf16.vlgmr.msrb.gmra.mxu1 %v3705_v53  ;;  %v3495_v53 = vld [vmem:[#allocation7 + $0x98] sm:$0xff] }
  0xd3   :  { %2157 = vmatpush.bf16.msra.mxu1 %v3491_v39  ;;  %1688 = vmatmul.bf16.vlgmr.msrb.gmra.mxu2 %v3707_v54  ;;  %v3478_v54 = vld [vmem:[#allocation7 + $0x10] sm:$0xff] }
  0xd4   :  { %2176 = vmatpush.bf16.msra.mxu2 %v3499_v42  ;;  %1707 = vmatmul.bf16.vlgmr.msrb.gmra.mxu3 %v3709_v57  ;;  %v3486_v57 = vld [vmem:[#allocation7 + $0x50] sm:$0xff] }
  0xd5   :  { %2195 = vmatpush.bf16.msra.mxu3 %v3507_v27 }
  0xd6   :  { %2139 = vmatpush.bf16.msra.mxu0 %v3482_v43  ;;  %v1385_v0 = vpop.f32.mrf.mxu2  ;;  %v1349_v3 = vpop.f32.mrf.mxu0 }
  0xd7   :  { %2158 = vmatpush.bf16.msra.mxu1 %v3490_v45  ;;  %v1404_v1 = vpop.f32.mrf.mxu3  ;;  %v1368_v4 = vpop.f32.mrf.mxu1  ;;  %v1386_v41 = vadd.f32 %v1385_v0, %v1367_v21  ;;  %v3505_v45 = vld [vmem:[#allocation7 + $0xe8] sm:$0xff] }
  0xd8   :  { %2177 = vmatpush.bf16.msra.mxu2 %v3498_v46  ;;  %v1369_v22 = vadd.f32 %v1368_v4, %v1349_v3 }
  0xd9   :  { %v1405_v29 = vadd.f32 %v1404_v1, %v1386_v41  ;;  %2196 = vmatpush.bf16.msra.mxu3 %v3506_v32  ;;  %v3515_v41 = vld [vmem:[#allocation7 + $0x138] sm:$0xff] }
  0xda   :  { %2140 = vmatpush.bf16.msra.mxu0 %v3481_v58  ;;  %v1296_v58 = vadd.f32 %v3773_v15, %v3771_v10 }
  0xdb   :  { %2159 = vmatpush.bf16.msra.mxu1 %v3489_v59  ;;  %v1719_v39 = vmul.f32 %v1405_v29, %v1405_v29  ;;  %v3513_v29 = vld [vmem:[#allocation7 + $0x128] sm:$0xff] }
  0xdc   :  { %2178 = vmatpush.bf16.msra.mxu2 %v3497_v60  ;;  %v1315_v0 = vadd.f32 %v3779_v31, %v1296_v58 }
  0xdd   :  { %2197 = vmatpush.bf16.msra.mxu3 %v3505_v45 }
  0xde   :  { %2141 = vmatpush.bf16.msra.mxu0 %v3480_v61  ;;  %v1387_v7 = vpop.f32.mrf.mxu2  ;;  %v1352_v12 = vpop.f32.mrf.mxu0  ;;  %v3504_v61 = vld [vmem:[#allocation7 + $0xe0] sm:$0xff] }
  0xdf   :  { %2160 = vmatpush.bf16.msra.mxu1 %v3488_v62  ;;  %v1406_v11 = vpop.f32.mrf.mxu3  ;;  %v1371_v14 = vpop.f32.mrf.mxu1  ;;  %v1388_v24 = vadd.f32 %v1387_v7, %v1369_v22  ;;  %v1317_v62 = vadd.f32 %v3787_v47, %v1298_v36 }
  0xe0   :  { %2179 = vmatpush.bf16.msra.mxu2 %v3496_v63  ;;  %v1372_v59 = vadd.f32 %v1371_v14, %v1352_v12 }
  0xe1   :  { %1655 = vmatmul.bf16.gmra.mxu0 %v3715_v44  ;;  %2198 = vmatpush.bf16.msra.mxu3 %v3504_v61  ;;  %v1336_v35 = vadd.f32 %v3789_v49, %v1317_v62 }
  0xe2   :  { %2142 = vmatpush.bf16.msra.mxu0 %v3479_v5  ;;  %1674 = vmatmul.bf16.gmra.mxu1 %v3717_v50  ;;  %v3503_v5 = vld [vmem:[#allocation7 + $0xd8] sm:$0xff] }
  0xe3   :  { %2161 = vmatpush.bf16.msra.mxu1 %v3487_v48  ;;  %1693 = vmatmul.bf16.gmra.mxu2 %v3719_v51  ;;  %v1331_v51 = vadd.f32 %v3769_v8, %v1312_v23 }
  0xe4   :  { %2180 = vmatpush.bf16.msra.mxu2 %v3495_v53  ;;  %1712 = vmatmul.bf16.gmra.mxu3 %v3721_v56  ;;  %v1407_v56 = vadd.f32 %v1406_v11, %v1388_v24  ;;  %v1334_v53 = vadd.f32 %v3781_v34, %v1315_v0  ;;  %v3500_v34 = vld [vmem:[#allocation7 + $0xc0] sm:$0xff] }
  0xe5   :  { %v1724_v33 = vmul.f32 %v1331_v51, %v1331_v51  ;;  %2199 = vmatpush.bf16.msra.mxu3 %v3503_v5 }
  0xe6   :  { %2143 = vmatpush.bf16.msra.mxu0 %v3478_v54  ;;  %v1390_v26 = vpop.f32.mrf.mxu2  ;;  %v1354_v50 = vpop.f32.mrf.mxu0  ;;  %v1725_v38 = vmul.f32 %v1407_v56, %v1407_v56  ;;  %v1730_v31 = vmul.f32 %v1334_v53, %v1334_v53 }
  0xe7   :  { %2162 = vmatpush.bf16.msra.mxu1 %v3486_v57  ;;  %v1409_v44 = vpop.f32.mrf.mxu3  ;;  %v1373_v28 = vpop.f32.mrf.mxu1  ;;  %v1742_v8 = vpack.c.bf16 %v1724_v33, %v1718_v30  ;;  %v1391_v1 = vadd.f32 %v1390_v26, %v1372_v59  ;;  %v3502_v57 = vld [vmem:[#allocation7 + $0xd0] sm:$0xff] }
  0xe8   :  { %2181 = vmatpush.bf16.msra.mxu2 %v3494_v6  ;;  %v1743_v55 = vpack.c.bf16 %v1725_v38, %v1719_v39  ;;  %v1374_v60 = vadd.f32 %v1373_v28, %v1354_v50  ;;  %v1736_v6 = vmul.f32 %v1336_v35, %v1336_v35  ;;  %v3514_v50 = vld [vmem:[#allocation7 + $0x130] sm:$0xff] }
  0xe9   :  { %v1410_v54 = vadd.f32 %v1409_v44, %v1391_v1  ;;  %2200 = vmatpush.bf16.msra.mxu3 %v3502_v57  ;;  %v3509_v1 = vld [vmem:[#allocation7 + $0x108] sm:$0xff] }
  0xea   :  { %2144 = vmatpush.bf16.msra.mxu0 %v3477_v16  ;;  %v1748_v22 = vpack.c.bf16 %v1736_v6, %v1730_v31  ;;  %v3522_v31 = vld [vmem:[#allocation7 + $0x170] sm:$0xff] }
  0xeb   :  { %2163 = vmatpush.bf16.msra.mxu1 %v3485_v17  ;;  %v1731_v12 = vmul.f32 %v1410_v54, %v1410_v54  ;;  %v3501_v17 = vld [vmem:[#allocation7 + $0xc8] sm:$0xff] }
  0xec   :  { %2182 = vmatpush.bf16.msra.mxu2 %v3493_v19 }
  0xed   :  { %2201 = vmatpush.bf16.msra.mxu3 %v3501_v17 }
  0xee   :  { %2145 = vmatpush.bf16.msra.mxu0 %v3476_v9  ;;  %v1392_v42 = vpop.f32.mrf.mxu2  ;;  %v1423_v46 = vpop.f32.mrf.mxu0 }
  0xef   :  { %2164 = vmatpush.bf16.msra.mxu1 %v3484_v13  ;;  %v1411_v43 = vpop.f32.mrf.mxu3  ;;  %v1442_v52 = vpop.f32.mrf.mxu1  ;;  %v1393_v63 = vadd.f32 %v1392_v42, %v1374_v60  ;;  %v3512_v42 = vld [vmem:[#allocation7 + $0x120] sm:$0xff]  ;;  %v3510_v60 = vld [vmem:[#allocation7 + $0x110] sm:$0xff] }
  0xf0   :  { %2183 = vmatpush.bf16.msra.mxu2 %v3492_v25  ;;  %v1443_v10 = vadd.f32 %v1442_v52, %v1423_v46 }
  0xf1   :  { %2146 = vmatmul.bf16.vlgmr.msra.gmra.mxu0 %v1742_v8  ;;  %v1412_v40 = vadd.f32 %v1411_v43, %v1393_v63  ;;  %2202 = vmatpush.bf16.msra.mxu3 %v3500_v34 }
  0xf2   :  { %2165 = vmatmul.bf16.vlgmr.msra.gmra.mxu1 %v1743_v55  ;;  %2214 = vmatpush.bf16.msrb.mxu0 %v3515_v41  ;;  %v3511_v55 = vld [vmem:[#allocation7 + $0x118] sm:$0xff] }
  0xf3   :  { %v1737_v7 = vmul.f32 %v1412_v40, %v1412_v40 }
  0xf4   :  { %3524 = vmatpush.bf16.msrb.mxu2 %v3515_v41 }
  0xf5   :  { %v1749_v21 = vpack.c.bf16 %v1737_v7, %v1731_v12 }
  0xf6   :  { %v1461_v3 = vpop.f32.mrf.mxu2  ;;  %v1425_v15 = vpop.f32.mrf.mxu0  ;;  %2215 = vmatpush.bf16.msrb.mxu0 %v3514_v50 }
  0xf7   :  { %v1480_v4 = vpop.f32.mrf.mxu3  ;;  %v1444_v48 = vpop.f32.mrf.mxu1  ;;  %v1462_v47 = vadd.f32 %v1461_v3, %v1443_v10 }
  0xf8   :  { %v1445_v11 = vadd.f32 %v1444_v48, %v1425_v15  ;;  %3525 = vmatpush.bf16.msrb.mxu2 %v3514_v50  ;;  %v3508_v48 = vld [vmem:[#allocation7 + $0x100] sm:$0xff] }
  0xf9   :  { %v1481_v18 = vadd.f32 %v1480_v4, %v1462_v47  ;;  %v3523_v47 = vld [vmem:[#allocation7 + $0x178] sm:$0xff] }
  0xfa   :  { %2216 = vmatpush.bf16.msrb.mxu0 %v3513_v29  ;;  %2233 = vmatpush.bf16.msrb.mxu1 %v3523_v47 }
  0xfb   :  { %v1720_v24 = vmul.f32 %v1481_v18, %v1481_v18  ;;  %3532 = vmatpush.bf16.msrb.mxu3 %v3523_v47  ;;  %v3521_v18 = vld [vmem:[#allocation7 + $0x168] sm:$0xff] }
  0xfc   :  { %3526 = vmatpush.bf16.msrb.mxu2 %v3513_v29 }
  0xfe   :  { %v1463_v14 = vpop.f32.mrf.mxu2  ;;  %v1428_v20 = vpop.f32.mrf.mxu0  ;;  %2217 = vmatpush.bf16.msrb.mxu0 %v3512_v42  ;;  %2234 = vmatpush.bf16.msrb.mxu1 %v3522_v31 }
  0xff   :  { %v1482_v16 = vpop.f32.mrf.mxu3  ;;  %v1464_v19 = vadd.f32 %v1463_v14, %v1445_v11  ;;  %v1447_v49 = vpop.f32.mrf.mxu1  ;;  %3533 = vmatpush.bf16.msrb.mxu3 %v3522_v31 }
 0x100   :  { %v1448_v26 = vadd.f32 %v1447_v49, %v1428_v20  ;;  %3527 = vmatpush.bf16.msrb.mxu2 %v3512_v42 }
 0x101   :  { %v1483_v23 = vadd.f32 %v1482_v16, %v1464_v19  ;;  %2151 = vmatmul.bf16.gmra.mxu0 %v1748_v22 }
 0x102   :  { %2170 = vmatmul.bf16.gmra.mxu1 %v1749_v21  ;;  %2218 = vmatpush.bf16.msrb.mxu0 %v3511_v55 }
 0x103   :  { %v1726_v9 = vmul.f32 %v1483_v23, %v1483_v23  ;;  %2235 = vmatpush.bf16.msrb.mxu1 %v3521_v18  ;;  %3534 = vmatpush.bf16.msrb.mxu3 %v3521_v18  ;;  %v3520_v23 = vld [vmem:[#allocation7 + $0x160] sm:$0xff] }
 0x104   :  { %3528 = vmatpush.bf16.msrb.mxu2 %v3511_v55 }
 0x105   :  { %v1744_v13 = vpack.c.bf16 %v1726_v9, %v1720_v24 }
 0x106   :  { %v1466_v25 = vpop.f32.mrf.mxu2  ;;  %v1430_v44 = vpop.f32.mrf.mxu0  ;;  %2219 = vmatpush.bf16.msrb.mxu0 %v3510_v60 }
 0x107   :  { %v1485_v37 = vpop.f32.mrf.mxu3  ;;  %2184 = vmatmul.bf16.vlgmr.msra.gmra.mxu2 %v1744_v13  ;;  %v1449_v27 = vpop.f32.mrf.mxu1  ;;  %v1467_v28 = vadd.f32 %v1466_v25, %v1448_v26  ;;  %2236 = vmatpush.bf16.msrb.mxu1 %v3520_v23 }
 0x108   :  { %v1450_v51 = vadd.f32 %v1449_v27, %v1430_v44  ;;  %3529 = vmatpush.bf16.msrb.mxu2 %v3510_v60  ;;  %3535 = vmatpush.bf16.msrb.mxu3 %v3520_v23  ;;  %v3518_v27 = vld [vmem:[#allocation7 + $0x150] sm:$0xff] }
 0x109   :  { %v1486_v32 = vadd.f32 %v1485_v37, %v1467_v28  ;;  %v3519_v37 = vld [vmem:[#allocation7 + $0x158] sm:$0xff] }
 0x10a   :  { %2220 = vmatpush.bf16.msrb.mxu0 %v3509_v1 }
 0x10b   :  { %v1732_v43 = vmul.f32 %v1486_v32, %v1486_v32  ;;  %2237 = vmatpush.bf16.msrb.mxu1 %v3519_v37 }
 0x10c   :  { %3530 = vmatpush.bf16.msrb.mxu2 %v3509_v1  ;;  %3536 = vmatpush.bf16.msrb.mxu3 %v3519_v37 }
 0x10e   :  { %v1468_v56 = vpop.f32.mrf.mxu2  ;;  %v1499_v38 = vpop.f32.mrf.mxu0  ;;  %2221 = vmatpush.bf16.msrb.mxu0 %v3508_v48 }
 0x10f   :  { %v1487_v2 = vpop.f32.mrf.mxu3  ;;  %v1469_v33 = vadd.f32 %v1468_v56, %v1450_v51  ;;  %v1518_v30 = vpop.f32.mrf.mxu1  ;;  %2238 = vmatpush.bf16.msrb.mxu1 %v3518_v27 }
 0x110   :  { %v1519_v58 = vadd.f32 %v1518_v30, %v1499_v38  ;;  %3531 = vmatpush.bf16.msrb.mxu2 %v3508_v48  ;;  %3537 = vmatpush.bf16.msrb.mxu3 %v3518_v27 }
 0x111   :  { %v1488_v39 = vadd.f32 %v1487_v2, %v1469_v33  ;;  %v3517_v2 = vld [vmem:[#allocation7 + $0x148] sm:$0xff] }
 0x113   :  { %v1738_v45 = vmul.f32 %v1488_v39, %v1488_v39  ;;  %2239 = vmatpush.bf16.msrb.mxu1 %v3517_v2  ;;  %v3516_v39 = vld [vmem:[#allocation7 + $0x140] sm:$0xff] }
 0x114   :  { %3538 = vmatpush.bf16.msrb.mxu3 %v3517_v2 }
 0x115   :  { %v1750_v46 = vpack.c.bf16 %v1738_v45, %v1732_v43 }
 0x116   :  { %v1537_v52 = vpop.f32.mrf.mxu2  ;;  %v1501_v36 = vpop.f32.mrf.mxu0 }
 0x117   :  { %v1556_v8 = vpop.f32.mrf.mxu3  ;;  %2189 = vmatmul.bf16.gmra.mxu2 %v1750_v46  ;;  %v1520_v59 = vpop.f32.mrf.mxu1  ;;  %v1538_v61 = vadd.f32 %v1537_v52, %v1519_v58  ;;  %2240 = vmatpush.bf16.msrb.mxu1 %v3516_v39 }
 0x118   :  { %v1521_v62 = vadd.f32 %v1520_v59, %v1501_v36  ;;  %3539 = vmatpush.bf16.msrb.mxu3 %v3516_v39 }
 0x119   :  { %v1557_v3 = vadd.f32 %v1556_v8, %v1538_v61 }
 0x11b   :  { %v1721_v35 = vmul.f32 %v1557_v3, %v1557_v3 }
 0x11e   :  { %v1539_v63 = vpop.f32.mrf.mxu2  ;;  %v1504_v5 = vpop.f32.mrf.mxu0 }
 0x11f   :  { %v1558_v0 = vpop.f32.mrf.mxu3  ;;  %v1540_v4 = vadd.f32 %v1539_v63, %v1521_v62  ;;  %v1523_v10 = vpop.f32.mrf.mxu1 }
 0x120   :  { %v1524_v6 = vadd.f32 %v1523_v10, %v1504_v5 }
 0x121   :  { %v1559_v15 = vadd.f32 %v1558_v0, %v1540_v4 }
 0x123   :  { %v1727_v40 = vmul.f32 %v1559_v15, %v1559_v15 }
 0x125   :  { %v1745_v53 = vpack.c.bf16 %v1727_v40, %v1721_v35 }
 0x126   :  { %v1542_v54 = vpop.f32.mrf.mxu2  ;;  %v1506_v7 = vpop.f32.mrf.mxu0 }
 0x127   :  { %v1561_v57 = vpop.f32.mrf.mxu3  ;;  %2203 = vmatmul.bf16.vlgmr.msra.gmra.mxu3 %v1745_v53  ;;  %v1525_v11 = vpop.f32.mrf.mxu1  ;;  %v1543_v12 = vadd.f32 %v1542_v54, %v1524_v6 }
 0x128   :  { %v1526_v14 = vadd.f32 %v1525_v11, %v1506_v7 }
 0x129   :  { %v1562_v19 = vadd.f32 %v1561_v57, %v1543_v12 }
 0x12b   :  { %v1733_v34 = vmul.f32 %v1562_v19, %v1562_v19 }
 0x12e   :  { %v1544_v16 = vpop.f32.mrf.mxu2  ;;  %v1575_v49 = vpop.f32.mrf.mxu0 }
 0x12f   :  { %v1563_v17 = vpop.f32.mrf.mxu3  ;;  %v1545_v20 = vadd.f32 %v1544_v16, %v1526_v14  ;;  %v1594_v21 = vpop.f32.mrf.mxu1 }
 0x130   :  { %v1595_v41 = vadd.f32 %v1594_v21, %v1575_v49 }
 0x131   :  { %v1564_v22 = vadd.f32 %v1563_v17, %v1545_v20 }
 0x133   :  { %v1739_v24 = vmul.f32 %v1564_v22, %v1564_v22 }
 0x135   :  { %v1751_v9 = vpack.c.bf16 %v1739_v24, %v1733_v34 }
 0x136   :  { %v1613_v13 = vpop.f32.mrf.mxu2  ;;  %v1577_v26 = vpop.f32.mrf.mxu0 }
 0x137   :  { %v1632_v25 = vpop.f32.mrf.mxu3  ;;  %2208 = vmatmul.bf16.gmra.mxu3 %v1751_v9  ;;  %v1596_v44 = vpop.f32.mrf.mxu1  ;;  %v1614_v50 = vadd.f32 %v1613_v13, %v1595_v41 }
 0x138   :  { %v1597_v28 = vadd.f32 %v1596_v44, %v1577_v26 }
 0x139   :  { %v1633_v29 = vadd.f32 %v1632_v25, %v1614_v50 }
 0x13b   :  { %v1722_v42 = vmul.f32 %v1633_v29, %v1633_v29 }
 0x13e   :  { %v1615_v51 = vpop.f32.mrf.mxu2  ;;  %v1580_v33 = vpop.f32.mrf.mxu0 }
 0x13f   :  { %v1634_v56 = vpop.f32.mrf.mxu3  ;;  %v1616_v32 = vadd.f32 %v1615_v51, %v1597_v28  ;;  %v1599_v38 = vpop.f32.mrf.mxu1 }
 0x140   :  { %v1600_v8 = vadd.f32 %v1599_v38, %v1580_v33 }
 0x141   :  { %v1635_v30 = vadd.f32 %v1634_v56, %v1616_v32 }
 0x143   :  { %v1728_v43 = vmul.f32 %v1635_v30, %v1635_v30 }
 0x145   :  { %v1746_v45 = vpack.c.bf16 %v1728_v43, %v1722_v42 }
 0x146   :  { %v1618_v46 = vpop.f32.mrf.mxu2  ;;  %v1582_v55 = vpop.f32.mrf.mxu0 }
 0x147   :  { %v1637_v52 = vpop.f32.mrf.mxu3  ;;  %2222 = vmatmul.bf16.vlgmr.msrb.gmra.mxu0 %v1746_v45  ;;  %v1601_v58 = vpop.f32.mrf.mxu1  ;;  %v1619_v36 = vadd.f32 %v1618_v46, %v1600_v8 }
 0x148   :  { %v1602_v59 = vadd.f32 %v1601_v58, %v1582_v55 }
 0x149   :  { %v1638_v62 = vadd.f32 %v1637_v52, %v1619_v36 }
 0x14b   :  { %v1734_v4 = vmul.f32 %v1638_v62, %v1638_v62 }
 0x14e   :  { %v1620_v60 = vpop.f32.mrf.mxu2  ;;  %v1651_v0 = vpop.f32.mrf.mxu0 }
 0x14f   :  { %v1639_v61 = vpop.f32.mrf.mxu3  ;;  %v1621_v63 = vadd.f32 %v1620_v60, %v1602_v59  ;;  %v1670_v1 = vpop.f32.mrf.mxu1 }
 0x150   :  { %v1671_v35 = vadd.f32 %v1670_v1, %v1651_v0 }
 0x151   :  { %v1640_v3 = vadd.f32 %v1639_v61, %v1621_v63 }
 0x153   :  { %v1740_v5 = vmul.f32 %v1640_v3, %v1640_v3 }
 0x155   :  { %v1752_v10 = vpack.c.bf16 %v1740_v5, %v1734_v4 }
 0x156   :  { %v1689_v15 = vpop.f32.mrf.mxu2  ;;  %v1653_v40 = vpop.f32.mrf.mxu0 }
 0x157   :  { %v1708_v48 = vpop.f32.mrf.mxu3  ;;  %2227 = vmatmul.bf16.vlgmr.msrb.gmra.mxu2 %v1752_v10  ;;  %v1672_v53 = vpop.f32.mrf.mxu1  ;;  %v1690_v54 = vadd.f32 %v1689_v15, %v1671_v35 }
 0x158   :  { %v1673_v57 = vadd.f32 %v1672_v53, %v1653_v40 }
 0x159   :  { %v1709_v7 = vadd.f32 %v1708_v48, %v1690_v54 }
 0x15b   :  { %v1723_v16 = vmul.f32 %v1709_v7, %v1709_v7 }
 0x15e   :  { %v1691_v47 = vpop.f32.mrf.mxu2  ;;  %v1656_v31 = vpop.f32.mrf.mxu0 }
 0x15f   :  { %v1710_v6 = vpop.f32.mrf.mxu3  ;;  %v1692_v11 = vadd.f32 %v1691_v47, %v1673_v57  ;;  %v1675_v12 = vpop.f32.mrf.mxu1 }
 0x160   :  { %v1676_v49 = vadd.f32 %v1675_v12, %v1656_v31 }
 0x161   :  { %v1711_v14 = vadd.f32 %v1710_v6, %v1692_v11 }
 0x163   :  { %v1729_v17 = vmul.f32 %v1711_v14, %v1711_v14 }
 0x165   :  { %v1747_v18 = vpack.c.bf16 %v1729_v17, %v1723_v16 }
 0x166   :  { %v1694_v19 = vpop.f32.mrf.mxu2  ;;  %v1658_v21 = vpop.f32.mrf.mxu0 }
 0x167   :  { %v1713_v20 = vpop.f32.mrf.mxu3  ;;  %2241 = vmatmul.bf16.vlgmr.msrb.gmra.mxu1 %v1747_v18  ;;  %v1677_v22 = vpop.f32.mrf.mxu1  ;;  %v1695_v23 = vadd.f32 %v1694_v19, %v1676_v49 }
 0x168   :  { %v1678_v34 = vadd.f32 %v1677_v22, %v1658_v21 }
 0x169   :  { %v1714_v9 = vadd.f32 %v1713_v20, %v1695_v23 }
 0x16b   :  { %v1735_v41 = vmul.f32 %v1714_v9, %v1714_v9 }
 0x16e   :  { %v1696_v24 = vpop.f32.mrf.mxu2  ;;  %v2147_v27 = vpop.f32.mrf.mxu0 }
 0x16f   :  { %v1697_v13 = vadd.f32 %v1696_v24, %v1678_v34  ;;  %v1715_v25 = vpop.f32.mrf.mxu3  ;;  %v2166_v50 = vpop.f32.mrf.mxu1  ;;  %v2148_v30 = vadd.f32 1e-06, %v2147_v27 }
 0x171   :  { %v1716_v37 = vadd.f32 %v1715_v25, %v1697_v13  ;;  %v2167_v42 = vadd.f32 %v2166_v50, %v2148_v30 }
 0x173   :  { %v1741_v26 = vmul.f32 %v1716_v37, %v1716_v37 }
 0x175   :  { %v1753_v44 = vpack.c.bf16 %v1741_v26, %v1735_v41 }
 0x176   :  { %v2149_v28 = vpop.f32.mrf.mxu0 }
 0x177   :  { %2246 = vmatmul.bf16.vlgmr.msrb.gmra.mxu3 %v1753_v44  ;;  %v2168_v51 = vpop.f32.mrf.mxu1  ;;  %v2150_v52 = vadd.f32 1e-06, %v2149_v28 }
 0x179   :  { %v2169_v59 = vadd.f32 %v2168_v51, %v2150_v52 }
 0x17e   :  { %v2152_v56 = vpop.f32.mrf.mxu0 }
 0x17f   :  { %v2171_v29 = vpop.f32.mrf.mxu1  ;;  %v2153_v48 = vadd.f32 1e-06, %v2152_v56 }
 0x181   :  { %v2172_v40 = vadd.f32 %v2171_v29, %v2153_v48 }
 0x186   :  { %v2154_v33 = vpop.f32.mrf.mxu0 }
 0x187   :  { %v2173_v39 = vpop.f32.mrf.mxu1  ;;  %v2155_v6 = vadd.f32 1e-06, %v2154_v33 }
 0x189   :  { %v2174_v12 = vadd.f32 %v2173_v39, %v2155_v6 }
 0x18a   :  { %v2185_v2 = vpop.f32.mrf.mxu2 }
 0x18b   :  { %v2186_v46 = vadd.f32 %v2185_v2, %v2167_v42 }
 0x192   :  { %v2187_v38 = vpop.f32.mrf.mxu2 }
 0x193   :  { %v2188_v61 = vadd.f32 %v2187_v38, %v2169_v59 }
 0x19a   :  { %v2190_v55 = vpop.f32.mrf.mxu2 }
 0x19b   :  { %v2191_v57 = vadd.f32 %v2190_v55, %v2172_v40 }
 0x1a2   :  { %v2192_v3 = vpop.f32.mrf.mxu2 }
 0x1a3   :  { %v2193_v16 = vadd.f32 %v2192_v3, %v2174_v12 }
 0x1aa   :  { %v2204_v32 = vpop.f32.mrf.mxu3 }
 0x1ab   :  { %v2205_v8 = vadd.f32 %v2204_v32, %v2186_v46 }
 0x1b2   :  { %v2206_v43 = vpop.f32.mrf.mxu3 }
 0x1b3   :  { %v2207_v0 = vadd.f32 %v2206_v43, %v2188_v61 }
 0x1ba   :  { %v2209_v62 = vpop.f32.mrf.mxu3 }
 0x1bb   :  { %v2210_v7 = vadd.f32 %v2209_v62, %v2191_v57 }
 0x1c2   :  { %v2211_v35 = vpop.f32.mrf.mxu3 }
 0x1c3   :  { %v2212_v18 = vadd.f32 %v2211_v35, %v2193_v16 }
 0x1c4   :  { %v2223_v45 = vpop.f32.mrf.mxu0 }
 0x1c5   :  { %v2224_v58 = vadd.f32 %v2223_v45, %v2205_v8 }
 0x1cc   :  { %v2225_v63 = vpop.f32.mrf.mxu0 }
 0x1cd   :  { %v2226_v1 = vadd.f32 %v2225_v63, %v2207_v0 }
 0x1da   :  { %v2228_v53 = vpop.f32.mrf.mxu2 }
 0x1db   :  { %v2229_v11 = vadd.f32 %v2228_v53, %v2210_v7 }
 0x1e2   :  { %v2230_v17 = vpop.f32.mrf.mxu2 }
 0x1e3   :  { %v2231_v19 = vadd.f32 %v2230_v17, %v2212_v18 }
 0x1e4   :  { %v2242_v36 = vpop.f32.mrf.mxu1 }
 0x1e5   :  { %v2243_v60 = vadd.f32 %v2242_v36, %v2224_v58 }
 0x1e7   :  { %3552 = vlog2.f32 %v2243_v60 }
 0x1ec   :  { %v2244_v4 = vpop.f32.mrf.mxu1 }
 0x1ed   :  { %v3553_v5 = vpop.eup %3552  ;;  %v2245_v10 = vadd.f32 %v2244_v4, %v2226_v1 }
 0x1ee   :  { %v2253_v15 = vmul.f32 0.6931472, %v3553_v5 }
 0x1ef   :  { %3554 = vlog2.f32 %v2245_v10 }
 0x1f0   :  { %2260 = vst [vmem:[#allocation8] sm:$0xff] %v2253_v15 }
 0x1f5   :  { %v3555_v54 = vpop.eup %3554 }
 0x1f6   :  { %v2255_v47 = vmul.f32 0.6931472, %v3555_v54 }
 0x1f8   :  { %2261 = vst [vmem:[#allocation8 + $0x8] sm:$0xff] %v2255_v47 }
 0x1fa   :  { %v2247_v31 = vpop.f32.mrf.mxu3 }
 0x1fb   :  { %v2248_v14 = vadd.f32 %v2247_v31, %v2229_v11 }
 0x1fd   :  { %3556 = vlog2.f32 %v2248_v14 }
 0x202   :  { %v2249_v20 = vpop.f32.mrf.mxu3 }
 0x203   :  { %v3557_v49 = vpop.eup %3556  ;;  %v2250_v21 = vadd.f32 %v2249_v20, %v2231_v19 }
 0x204   :  { %v2257_v22 = vmul.f32 0.6931472, %v3557_v49 }
 0x205   :  { %3558 = vlog2.f32 %v2250_v21 }
 0x206   :  { %2262 = vst [vmem:[#allocation8 + $0x10] sm:$0xff] %v2257_v22 }
 0x20b   :  { %v3559_v23 = vpop.eup %3558 }
 0x20c   :  { %v2259_v34 = vmul.f32 0.6931472, %v3559_v23 }
 0x20e   :  { %2263 = vst [vmem:[#allocation8 + $0x18] sm:$0xff] %v2259_v34 }
 0x20f   :  { %2276 = dma.vmem_to_hbm [thread:$0]  %s2269_s4, 512, %s2271_s7, [#allocation4], %s3672_s8, %s3672_s8, %s3673_s9  }
 0x210   :  { %3660 = dma.done.wait [#allocation4], 512  }
 0x211   :  { %3661 = vsyncadd [#allocation4], 4294966784 }
 0x212   :  { %2281 = vsyncpa [#allocation3], 1 }
 0x213   :  { %2282 = vsyncpa [#allocation6], 1 }
 0x214   :  { %2283 = vsyncpa [#allocation4], 1 }

</bundles_post_ra>
